<compile_context>
chip_gen: v5e
topology: v5e:2x2
jax: 0.10.0
libtpu: 0.0.40
codegen_flags: <defaults>
</compile_context>

<pallas_src>
import functools
import math

import jax
import jax.numpy as jnp
import numpy as np
from jax.experimental import pallas as pl
from jax.experimental.pallas import tpu as pltpu


# ---------------------------------------------------------------------------
# Kernel
# ---------------------------------------------------------------------------
def _time_embed_kernel(freq_ref, phase_ref, x_ref, o_ref):
    """freq_ref/phase_ref: (1, d_embed) resident tables ([down|down], [0|pi/2]).
    x_ref: (bn, 1) f32 timesteps.  o_ref: (bn, d_embed) f32 embedding."""
    # sin(x*down + 0)     == sin(x*down)   -> first  half of the lanes
    # sin(x*down + pi/2)  == cos(x*down)   -> second half of the lanes
    o_ref[...] = jnp.sin(x_ref[...] * freq_ref[...] + phase_ref[...])


def _round_up(x, m):
    return ((x + m - 1) // m) * m


# ---------------------------------------------------------------------------
# Wrapper
# ---------------------------------------------------------------------------
def time_embed(x, d_embed, max_freq=10 ** 4, block_n=4096):
    """Pallas TimeEmbed forward. x: (N,) float -> (N, d_embed) float32."""
    assert d_embed % 2 == 0 and d_embed >= 4
    half_d = d_embed // 2
    n = x.shape[0]

    # Row tile choice: as large as practical (HBM-write-bound kernel), but
    # keep grid_n >= 2 for mid/large N so v7x megacore uses both TensorCores.
    if n <= block_n:
        bn = n
        if n >= 2048:                       # halves are still big tiles
            bn = _round_up(pl.cdiv(n, 2), 8)
    else:
        bn = block_n
    grid_n = pl.cdiv(n, bn)
    n_pad = grid_n * bn

    x2 = x.astype(jnp.float32).reshape(n, 1)
    if n_pad != n:                          # only when the grid is ragged
        x2 = jnp.pad(x2, ((0, n_pad - n), (0, 0)))

    # Frequency / phase tables (tiny, built once; resident across the grid).
    j = jnp.arange(half_d, dtype=jnp.float32)
    down = jnp.exp((-math.log(max_freq) / (half_d - 1)) * j)        # (half_d,)
    freq = jnp.concatenate([down, down]).reshape(1, d_embed)
    phase = jnp.concatenate(
        [jnp.zeros((half_d,), jnp.float32),
         jnp.full((half_d,), 0.5 * math.pi, jnp.float32)]).reshape(1, d_embed)

    out = pl.pallas_call(
        _time_embed_kernel,
        out_shape=jax.ShapeDtypeStruct((n_pad, d_embed), jnp.float32),
        grid=(grid_n,),
        in_specs=[
            pl.BlockSpec((1, d_embed), lambda i: (0, 0)),   # freq  (resident)
            pl.BlockSpec((1, d_embed), lambda i: (0, 0)),   # phase (resident)
            pl.BlockSpec((bn, 1), lambda i: (i, 0)),        # timesteps
        ],
        out_specs=pl.BlockSpec((bn, d_embed), lambda i: (i, 0)),
        compiler_params=pltpu.CompilerParams(
            dimension_semantics=("parallel",)),
        cost_estimate=pl.CostEstimate(
            flops=2 * n_pad * d_embed,
            transcendentals=n_pad * d_embed,
            bytes_accessed=4 * (n_pad + n_pad * d_embed + 2 * d_embed)),
    )(freq, phase, x2)
    return out[:n] if n_pad != n else out


# ---------------------------------------------------------------------------
# Pure-JAX reference (mirrors the PyTorch module)
# ---------------------------------------------------------------------------
def ref_time_embed(x, d_embed, max_freq=10 ** 4):
    half_d = d_embed // 2
    down = jnp.exp(-math.log(max_freq)
                   * (jnp.arange(half_d).astype(jnp.float32) / (half_d - 1)))
    inner = x.astype(jnp.float32)[:, None] * down[None, :]
    return jnp.concatenate([jnp.sin(inner), jnp.cos(inner)], axis=-1)


# ---------------------------------------------------------------------------
if __name__ == "__main__":
    D_EMBED = 128        # typical diffusion time-embedding width (lane-dense)
    N = 64               # batch of timesteps
    key = jax.random.PRNGKey(0)
    # Timestep values like a diffusion schedule: floats in [0, 1000).
    x = jax.random.uniform(key, (N,), jnp.float32, 0.0, 1000.0)

    fwd = jax.jit(functools.partial(time_embed, d_embed=D_EMBED))
    out = jax.block_until_ready(fwd(x))
    ref = jax.block_until_ready(ref_time_embed(x, D_EMBED))

    assert out.shape == (N, D_EMBED)
    np.testing.assert_allclose(np.asarray(out), np.asarray(ref),
                               rtol=2e-3, atol=2e-3)
    print("KERNEL_OK")
</pallas_src>

<mosaic_0001>
module attributes {stable_mosaic.version = 11 : i64} {
  func.func @_time_embed_kernel(%arg0: i32, %arg1: memref<1x128xf32, #tpu.memory_space<vmem>>, %arg2: memref<1x128xf32, #tpu.memory_space<vmem>>, %arg3: memref<64x1xf32, #tpu.memory_space<vmem>>, %arg4: memref<64x128xf32, #tpu.memory_space<vmem>>) attributes {dimension_semantics = [#tpu.dimension_semantics<parallel>], iteration_bounds = array<i64: 1>, scalar_prefetch = 0 : i64, scratch_operands = 0 : i64, tpu.core_type = #tpu.core_type<tc>, window_params = [{pipeline_mode = #tpu.pipeline_mode<synchronous>, transform_indices = @transform_0, window_bounds = array<i64: 1, 128>}, {pipeline_mode = #tpu.pipeline_mode<synchronous>, transform_indices = @transform_1, window_bounds = array<i64: 1, 128>}, {transform_indices = @transform_2, window_bounds = array<i64: 64, 1>}, {transform_indices = @transform_3, window_bounds = array<i64: 64, 128>}]} {
    %c0 = arith.constant 0 : index
    %c0_0 = arith.constant 0 : index
    %0 = vector.load %arg3[%c0, %c0_0] : memref<64x1xf32, #tpu.memory_space<vmem>>, vector<64x1xf32>
    %c0_1 = arith.constant 0 : index
    %c0_2 = arith.constant 0 : index
    %1 = vector.load %arg1[%c0_1, %c0_2] : memref<1x128xf32, #tpu.memory_space<vmem>>, vector<1x128xf32>
    %2 = vector.broadcast %0 : vector<64x1xf32> to vector<64x128xf32>
    %3 = vector.broadcast %1 : vector<1x128xf32> to vector<64x128xf32>
    %4 = arith.mulf %2, %3 : vector<64x128xf32>
    %c0_3 = arith.constant 0 : index
    %c0_4 = arith.constant 0 : index
    %5 = vector.load %arg2[%c0_3, %c0_4] : memref<1x128xf32, #tpu.memory_space<vmem>>, vector<1x128xf32>
    %6 = vector.broadcast %5 : vector<1x128xf32> to vector<64x128xf32>
    %7 = arith.addf %4, %6 : vector<64x128xf32>
    %8 = math.sin %7 : vector<64x128xf32>
    %c0_5 = arith.constant 0 : index
    %c0_6 = arith.constant 0 : index
    %9 = vector.load %arg4[%c0_5, %c0_6] : memref<64x128xf32, #tpu.memory_space<vmem>>, vector<64x128xf32>
    tpu.vector_store %arg4[%c0_5, %c0_6], %8 {strides = array<i32>} : memref<64x128xf32, #tpu.memory_space<vmem>>, vector<64x128xf32>,
    return
  }
  func.func @transform_0(%arg0: i32) -> (i32, i32) {
    %c0_i32 = arith.constant 0 : i32
    %c0_i32_0 = arith.constant 0 : i32
    %c0_i32_1 = arith.constant 0 : i32
    return %c0_i32, %c0_i32_0 : i32, i32
  }
  func.func @transform_1(%arg0: i32) -> (i32, i32) {
    %c0_i32 = arith.constant 0 : i32
    %c0_i32_0 = arith.constant 0 : i32
    %c0_i32_1 = arith.constant 0 : i32
    return %c0_i32, %c0_i32_0 : i32, i32
  }
  func.func @transform_2(%arg0: i32) -> (i32, i32) {
    %c0_i32 = arith.constant 0 : i32
    %c0_i32_0 = arith.constant 0 : i32
    return %arg0, %c0_i32 : i32, i32
  }
  func.func @transform_3(%arg0: i32) -> (i32, i32) {
    %c0_i32 = arith.constant 0 : i32
    %c0_i32_0 = arith.constant 0 : i32
    return %arg0, %c0_i32 : i32, i32
  }
}

</mosaic_0001>

<bundles_post_ra>
// kernel: time_embed.1
= control target key start
LH: loop header
LB: loop body
LE: loop exit
PB: predicated region body
PF: predicated region fallthrough
CT: control target
= control target key end

     0   :  { %v1420_v3 = vmov 0   ;;  %s2350_s0 = inlined_call_operand.vmem [shape: f32[1,128], index: 0, kind: input, shape index: {}]   ;;  %s2351_s1 = inlined_call_operand.vmem [shape: f32[1,128], index: 1, kind: input, shape index: {}]   ;;  %s2352_s2 = inlined_call_operand.vmem [shape: f32[64,1], index: 2, kind: input, shape index: {}]   ;;  %s2353_s3 = inlined_call_operand.hbm [shape: f32[64,128], index: 3, kind: output, shape index: {}]  }
   0x1   :  { %v19_v0 = vld [vmem:[%s2352_s2 + $0x20] sm:$0xff]  ;;  %v17_v1 = vld [vmem:[%s2352_s2 + $0x10] sm:$0xff]  ;;  %1389 = vset.pattern.permute.xlu2 %v1420_v3  ;;  %1388 = vset.pattern.permute.xlu1 %v1420_v3 }
   0x2   :  { %v15_v2 = vld [vmem:[%s2352_s2] sm:$0xff]  ;;  %1387 = vset.pattern.permute.xlu0 %v1420_v3  ;;  %46 = vperm.xlu2 %1389, %v19_v0  }
   0x3   :  { %36 = vperm.xlu1 %1388, %v17_v1   ;;  %26 = vperm.xlu0 %1387, %v15_v2  }
   0x4   :  { %8 = vsyncpa [#allocation3], 0  ;;  %v20_v4 = vld [vmem:[%s2352_s2 + $0x28] sm:$0xff]  ;;  %v18_v5 = vld [vmem:[%s2352_s2 + $0x18] sm:$0xff]  ;;  %v1421_v32 = vmov 683565275  }
   0x5   :  { %v16_v6 = vld [vmem:[%s2352_s2 + $0x8] sm:$0xff]  ;;  %v22_v7 = vld [vmem:[%s2352_s2 + $0x38] sm:$0xff]  ;;  %v21_v8 = vld [vmem:[%s2352_s2 + $0x30] sm:$0xff]  ;;  %v1422_v34 = vmov 2475754826   ;;  %s1341_s8 = sshll.u32 %s2353_s3, 4  ;;  %s1342_s8 = int_to_ptr.hbm [resolvable:$true] %s1341_s8 }
   0x6   :  { %v1480_v9 = vld [vmem:[%s2350_s0] ss:$0 sm:$0xff]  ;;  %v1423_v36 = vmov 2131351028   ;;  %v1424_v38 = vmov 2102212464  }
   0x7   :  { %v1485_v10 = vld [vmem:[%s2351_s1] ss:$0 sm:$0xff]  ;;  %v1425_v40 = vmov 920167782   ;;  %v1426_v49 = vmov 1326507024  }
   0x8   :  { %s1427_s9 = smov [#allocation2]   ;;  %s1428_s11 = smov 128  }
   0x9   :  { %s1339_s10 = sshll.u32 %s1427_s9, 4  ;;  %s1429_s12 = smov 8   ;;  %s1340_s10 = int_to_ptr.vmem [resolvable:$true] %s1339_s10 }
   0xa   :  { %51 = vperm.xlu2 %1389, %v20_v4  }
   0xb   :  { %41 = vperm.xlu1 %1388, %v18_v5   ;;  %31 = vperm.xlu0 %1387, %v16_v6  }
  0x13   :  { %61 = vperm.xlu1 %1388, %v22_v7   ;;  %56 = vperm.xlu0 %1387, %v21_v8  }
  0x5c   :  { %v47_v11 = vpop.permute.xlu2 %46 }
  0x5d   :  { %v71_v12 = vmul.f32 %v1480_v9, %v47_v11 }
  0x5f   :  { %v1489_v13 = vadd.f32 %v1485_v10, %v71_v12 }
  0x61   :  { %v707_v14 = vand.u32 2147483647, %v1489_v13  ;;  %v710_v15 = vand.u32 2139095040, %v1489_v13 }
  0x63   :  { %v711_v16 = vshrl.u32 %v710_v15, 23  ;;  %v714_v17 = vand.u32 8388607, %v707_v14 }
  0x64   :  { %v52_v18 = vpop.permute.xlu2 %51 }
  0x65   :  { %v1365_v19 = vadd.s32 4294967169, %v711_v16  ;;  %v72_v20 = vmul.f32 %v1480_v9, %v52_v18  ;;  %v715_v21 = vor.u32 8388608, %v714_v17 }
  0x67   :  { %v717_v22 = vadd.s32 1, %v1365_v19  ;;  %v1497_v23 = vadd.f32 %v1485_v10, %v72_v20  ;;  %v1499_v25 = vshll.u32 %v715_v21, 8 }
  0x69   :  { %vm718_vm0 = vcmp.gt.s32.totalorder %v717_v22, 0  ;;  %v862_v26 = vand.u32 2147483647, %v1497_v23  ;;  %v865_v27 = vand.u32 2139095040, %v1497_v23  ;;  %v756_v42 = vand.u32 65535, %v1499_v25 }
  0x6a   :  { %v719_v24 = vsel %vm718_vm0, %v717_v22, 0  ;;  %v757_v57 = vshrl.u32 %v1499_v25, 16 }
  0x6b   :  { %v720_v28 = vshrl.u32 %v719_v24, 5  ;;  %v721_v29 = vand.u32 31, %v719_v24  ;;  %v866_v30 = vshrl.u32 %v865_v27, 23  ;;  %v869_v43 = vand.u32 8388607, %v862_v26 }
  0x6d   :  { %v722_v31 = vsub.s32 32, %v721_v29  ;;  %v724_v33 = vshll.u32 %v1421_v32, %v721_v29  ;;  %v727_v35 = vshll.u32 %v1422_v34, %v721_v29  ;;  %v730_v37 = vshll.u32 %v1423_v36, %v721_v29 }
  0x6e   :  { %v733_v39 = vshll.u32 %v1424_v38, %v721_v29  ;;  %v736_v41 = vshll.u32 %v1425_v40, %v721_v29  ;;  %vm739_vm1 = vcmp.lt.s32.totalorder %v720_v28, 1  ;;  %vm742_vm2 = vcmp.lt.s32.totalorder %v720_v28, 4 }
  0x6f   :  { %v725_v44 = vshrl.u32 %v1422_v34, %v722_v31  ;;  %v728_v45 = vshrl.u32 %v1423_v36, %v722_v31  ;;  %v731_v46 = vshrl.u32 %v1424_v38, %v722_v31  ;;  %v723_v47 = vshrl.u32 %v1421_v32, %v722_v31 }
  0x70   :  { %v734_v48 = vshrl.u32 %v1425_v40, %v722_v31  ;;  %v737_v50 = vshrl.u32 %v1426_v49, %v722_v31  ;;  %v1368_v54 = vadd.s32 4294967169, %v866_v30  ;;  %vm741_vm3 = vcmp.lt.s32.totalorder %v720_v28, 3 }
  0x71   :  { %v726_v51 = vor.u32 %v725_v44, %v724_v33  ;;  %v729_v52 = vor.u32 %v728_v45, %v727_v35  ;;  %v732_v53 = vor.u32 %v731_v46, %v730_v37  ;;  %vm740_vm4 = vcmp.lt.s32.totalorder %v720_v28, 2 }
  0x72   :  { %v735_v55 = vor.u32 %v734_v48, %v733_v39  ;;  %v738_v56 = vor.u32 %v737_v50, %v736_v41  ;;  %v870_v63 = vor.u32 8388608, %v869_v43  ;;  %v872_v0 = vadd.s32 1, %v1368_v54 }
  0x73   :  { %v744_v58 = vsel %vm742_vm2, %v732_v53, 2102212464  ;;  %v747_v59 = vsel %vm739_vm1, %v726_v51, %v729_v52  ;;  %v751_v60 = vsel %vm739_vm1, %v729_v52, %v732_v53  ;;  %v743_v1 = vsel %vm739_vm1, %v723_v47, %v726_v51 }
  0x74   :  { %v748_v61 = vsel %vm742_vm2, %v735_v55, 920167782  ;;  %v752_v62 = vsel %vm742_vm2, %v738_v56, 1326507024  ;;  %v745_v2 = vsel %vm741_vm3, %v729_v52, %v744_v58  ;;  %vm873_vm5 = vcmp.gt.s32.totalorder %v872_v0, 0 }
  0x75   :  { %v749_v4 = vsel %vm741_vm3, %v732_v53, %v748_v61  ;;  %v753_v5 = vsel %vm741_vm3, %v735_v55, %v752_v62  ;;  %v1524_v16 = vsel %vm740_vm4, %v743_v1, %v745_v2  ;;  %v1526_v20 = vshll.u32 %v870_v63, 8 }
  0x76   :  { %v750_v6 = vsel %vm740_vm4, %v747_v59, %v749_v4  ;;  %v754_v7 = vsel %vm740_vm4, %v751_v60, %v753_v5  ;;  %v874_v27 = vsel %vm873_vm5, %v872_v0, 0  ;;  %vm709_vm4 = vcmp.lt.s32.totalorder %v1489_v13, 0 }
  0x77   :  { %v758_v8 = vand.u32 65535, %v754_v7  ;;  %v759_v11 = vshrl.u32 %v754_v7, 16  ;;  %v780_v12 = vand.u32 65535, %v750_v6  ;;  %v781_v15 = vshrl.u32 %v750_v6, 16 }
  0x78   :  { %v876_v44 = vand.u32 31, %v874_v27  ;;  %v1533_v53 = vshrl.u32 %v874_v27, 5  ;;  %v911_v27 = vand.u32 65535, %v1526_v20  ;;  %vm1614_vm5 = vcmp.le.f32.partialorder %v707_v14, 0.7853982 }
  0x79   :  { %v760_v17 = vmul.u32 %v758_v8, %v756_v42  ;;  %v761_v18 = vmul.u32 %v759_v11, %v756_v42  ;;  %v762_v19 = vmul.u32 %v758_v8, %v757_v57  ;;  %v782_v21 = vmul.u32 %v780_v12, %v756_v42 }
  0x7a   :  { %v783_v22 = vmul.u32 %v781_v15, %v756_v42  ;;  %v784_v24 = vmul.u32 %v780_v12, %v757_v57  ;;  %v763_v29 = vmul.u32 %v759_v11, %v757_v57  ;;  %v785_v33 = vmul.u32 %v781_v15, %v757_v57 }
  0x7b   :  { %v764_v30 = vshll.u32 %v761_v18, 16  ;;  %v766_v31 = vshll.u32 %v762_v19, 16  ;;  %v765_v35 = vshrl.u32 %v761_v18, 16  ;;  %v767_v37 = vshrl.u32 %v762_v19, 16 }
  0x7c   :  { %v786_v39 = vshll.u32 %v783_v22, 16  ;;  %v788_v41 = vshll.u32 %v784_v24, 16  ;;  %v787_v43 = vshrl.u32 %v783_v22, 16  ;;  %v789_v46 = vshrl.u32 %v784_v24, 16 }
  0x7d   :  { %vm768_vm6 = vc.u32 %v760_v17, %v764_v30  ;;  %v770_v28 = vadd.s32 %v764_v30, %v760_v17  ;;  %v1530_v50 = vsub.s32 32, %v876_v44  ;;  %v879_v57 = vshll.u32 %v1421_v32, %v876_v44 }
  0x7e   :  { %v769_v45 = vsel %vm768_vm6, 1, %v1420_v3  ;;  %vm790_vm7 = vc.u32 %v782_v21, %v786_v39  ;;  %v792_v47 = vadd.s32 %v786_v39, %v782_v21  ;;  %v882_v60 = vshll.u32 %v1422_v34, %v876_v44 }
  0x7f   :  { %v771_v42 = vadd.s32 %v769_v45, %v763_v29  ;;  %vm772_vm8 = vc.u32 %v770_v28, %v766_v31  ;;  %v791_v48 = vsel %vm790_vm7, 1, %v1420_v3  ;;  %v880_v59 = vshrl.u32 %v1422_v34, %v1530_v50 }
  0x80   :  { %v773_v51 = vsel %vm772_vm8, 1, %v1420_v3  ;;  %v793_v52 = vadd.s32 %v791_v48, %v785_v33  ;;  %vm794_vm9 = vc.u32 %v792_v47, %v788_v41  ;;  %v1536_v56 = vadd.s32 %v792_v47, %v788_v41  ;;  %v37_v41 = vpop.permute.xlu1 %36 }
  0x81   :  { %v775_v54 = vadd.s32 %v773_v51, %v771_v42  ;;  %v795_v55 = vsel %vm794_vm9, 1, %v1420_v3  ;;  %v883_v61 = vshrl.u32 %v1423_v36, %v1530_v50  ;;  %v885_v63 = vshll.u32 %v1423_v36, %v876_v44 }
  0x82   :  { %v797_v58 = vadd.s32 %v795_v55, %v793_v52  ;;  %v886_v0 = vshrl.u32 %v1424_v38, %v1530_v50  ;;  %v888_v1 = vshll.u32 %v1424_v38, %v876_v44  ;;  %v1548_v4 = vor.u32 %v880_v59, %v879_v57 }
  0x83   :  { %v776_v62 = vadd.s32 %v775_v54, %v765_v35  ;;  %v1550_v5 = vor.u32 %v883_v61, %v882_v60  ;;  %v889_v6 = vshrl.u32 %v1425_v40, %v1530_v50  ;;  %v891_v11 = vshll.u32 %v1425_v40, %v876_v44 }
  0x84   :  { %v798_v2 = vadd.s32 %v797_v58, %v787_v43  ;;  %v887_v8 = vor.u32 %v886_v0, %v885_v63  ;;  %v892_v12 = vshrl.u32 %v1426_v49, %v1530_v50  ;;  %vm894_vm10 = vcmp.lt.s32.totalorder %v1533_v53, 1 }
  0x85   :  { %v1554_v7 = vadd.s32 %v776_v62, %v767_v37  ;;  %v890_v17 = vor.u32 %v889_v6, %v888_v1  ;;  %v800_v18 = vmul.u32 %v1499_v25, %v1524_v16  ;;  %vm896_vm12 = vcmp.lt.s32.totalorder %v1533_v53, 3 }
  0x86   :  { %v799_v15 = vadd.s32 %v798_v2, %v789_v46  ;;  %v893_v19 = vor.u32 %v892_v12, %v891_v11  ;;  %vm895_vm13 = vcmp.lt.s32.totalorder %v1533_v53, 2  ;;  %vm897_vm14 = vcmp.lt.s32.totalorder %v1533_v53, 4 }
  0x87   :  { %vm802_vm11 = vc.u32 %v1554_v7, %v1536_v56  ;;  %v902_v22 = vsel %vm894_vm10, %v1548_v4, %v1550_v5  ;;  %v903_v24 = vsel %vm897_vm14, %v890_v17, 920167782  ;;  %v906_v25 = vsel %vm894_vm10, %v1550_v5, %v887_v8 }
  0x88   :  { %v803_v21 = vadd.s32 1, %v799_v15  ;;  %v907_v16 = vsel %vm897_vm14, %v893_v19, 1326507024  ;;  %v904_v30 = vsel %vm896_vm12, %v887_v8, %v903_v24  ;;  %v912_v33 = vshrl.u32 %v1526_v20, 16 }
  0x89   :  { %v908_v31 = vsel %vm896_vm12, %v890_v17, %v907_v16  ;;  %v905_v37 = vsel %vm895_vm13, %v902_v22, %v904_v30  ;;  %v69_v51 = vmul.f32 %v1480_v9, %v37_v41  ;;  %v878_v63 = vshrl.u32 %v1421_v32, %v1530_v50  ;;  %v27_v16 = vpop.permute.xlu0 %26 }
  0x8a   :  { %v804_v29 = vsel %vm802_vm11, %v803_v21, %v799_v15  ;;  %v909_v39 = vsel %vm895_vm13, %v906_v25, %v908_v31  ;;  %v935_v44 = vand.u32 65535, %v905_v37  ;;  %v936_v45 = vshrl.u32 %v905_v37, 16 }
  0x8b   :  { %v805_v35 = vadd.s32 %v804_v29, %v800_v18  ;;  %v913_v28 = vand.u32 65535, %v909_v39  ;;  %v914_v43 = vshrl.u32 %v909_v39, 16  ;;  %v1592_v1 = vadd.f32 %v1485_v10, %v69_v51 }
  0x8c   :  { %v938_v55 = vmul.u32 %v936_v45, %v911_v27  ;;  %v937_v59 = vmul.u32 %v935_v44, %v911_v27  ;;  %v939_v60 = vmul.u32 %v935_v44, %v912_v33  ;;  %v940_v12 = vmul.u32 %v936_v45, %v912_v33 }
  0x8d   :  { %v806_v46 = vadd.s32 536870912, %v805_v35  ;;  %v915_v47 = vmul.u32 %v913_v28, %v911_v27  ;;  %v916_v42 = vmul.u32 %v914_v43, %v911_v27  ;;  %v917_v48 = vmul.u32 %v913_v28, %v912_v33 }
  0x8e   :  { %v918_v54 = vmul.u32 %v914_v43, %v912_v33  ;;  %v941_v62 = vshll.u32 %v938_v55, 16  ;;  %v943_v17 = vshll.u32 %v939_v60, 16  ;;  %v899_v19 = vsel %vm897_vm14, %v887_v8, 2102212464 }
  0x8f   :  { %v807_v52 = vshrl.u32 %v806_v46, 30  ;;  %v919_v57 = vshll.u32 %v916_v42, 16  ;;  %v921_v58 = vshll.u32 %v917_v48, 16  ;;  %v920_v6 = vshrl.u32 %v916_v42, 16 }
  0x90   :  { %vm945_vm1 = vc.u32 %v937_v59, %v941_v62  ;;  %v922_v21 = vshrl.u32 %v917_v48, 16  ;;  %v947_v25 = vadd.s32 %v941_v62, %v937_v59  ;;  %v397_v31 = vand.u32 2147483647, %v1592_v1 }
  0x91   :  { %v808_v61 = vshll.u32 %v807_v52, 30  ;;  %vm923_vm15 = vc.u32 %v915_v47, %v919_v57  ;;  %v925_v0 = vadd.s32 %v919_v57, %v915_v47  ;;  %v946_v24 = vsel %vm945_vm1, 1, %v1420_v3 }
  0x92   :  { %v924_v11 = vsel %vm923_vm15, 1, %v1420_v3  ;;  %v831_v29 = vsub.s32 4, %v807_v52  ;;  %v948_v30 = vadd.s32 %v946_v24, %v940_v12  ;;  %v942_v37 = vshrl.u32 %v938_v55, 16 }
  0x93   :  { %v809_v2 = vsub.s32 %v805_v35, %v808_v61  ;;  %v926_v15 = vadd.s32 %v924_v11, %v918_v54  ;;  %vm927_vm0 = vc.u32 %v925_v0, %v921_v58  ;;  %vm949_vm3 = vc.u32 %v947_v25, %v943_v17 }
  0x94   :  { %v928_v50 = vsel %vm927_vm0, 1, %v1420_v3  ;;  %v898_v8 = vsel %vm894_vm10, %v878_v63, %v1548_v4  ;;  %v950_v39 = vsel %vm949_vm3, 1, %v1420_v3  ;;  %v67_v41 = vmul.f32 %v1480_v9, %v27_v16 }
  0x95   :  { %vm810_vm2 = vcmp.lt.s32.totalorder %v809_v2, 0  ;;  %v811_v18 = vsub.s32 0, %v809_v2  ;;  %v930_v22 = vadd.s32 %v928_v50, %v926_v15  ;;  %v900_v43 = vsel %vm896_vm12, %v1550_v5, %v899_v19 }
  0x96   :  { %v944_v44 = vshrl.u32 %v939_v60, 16  ;;  %v952_v45 = vadd.s32 %v950_v39, %v948_v30  ;;  %v951_v47 = vadd.s32 %v947_v25, %v943_v17  ;;  %v400_v42 = vand.u32 2139095040, %v1592_v1 }
  0x97   :  { %v812_v27 = vsel %vm810_vm2, %v811_v18, %v809_v2  ;;  %v931_v35 = vadd.s32 %v930_v22, %v920_v6  ;;  %v404_v48 = vand.u32 8388607, %v397_v31  ;;  %v832_v51 = vsel %vm709_vm4, %v831_v29, %v807_v52 }
  0x98   :  { %v813_v33 = vclz %v812_v27  ;;  %v953_v5 = vadd.s32 %v952_v45, %v942_v37  ;;  %v801_v54 = vadd.s32 %v1536_v56, %v1554_v7  ;;  %v401_v57 = vshrl.u32 %v400_v42, 23 }
  0x99   :  { %v932_v46 = vadd.s32 %v931_v35, %v922_v21  ;;  %v1623_v58 = vadd.f32 %v1485_v10, %v67_v41  ;;  %v901_v14 = vsel %vm895_vm13, %v898_v8, %v900_v43  ;;  %v834_v62 = vsel %vm1614_vm5, 0, %v832_v51 }
  0x9a   :  { %v1366_v28 = vadd.s32 4294967294, %v813_v33  ;;  %v954_v61 = vadd.s32 %v953_v5, %v944_v44  ;;  %v1359_v52 = vadd.s32 4294967169, %v401_v57  ;;  %v405_v63 = vor.u32 8388608, %v404_v48 }
  0x9b   :  { %vm957_vm7 = vc.u32 %v932_v46, %v951_v47  ;;  %v955_v11 = vmul.u32 %v1526_v20, %v901_v14  ;;  %v90_v12 = vand.u32 2139095040, %v1623_v58  ;;  %v851_v18 = vadd.s32 3, %v834_v62 }
  0x9c   :  { %vm1367_vm6 = vcmp.lt.s32.totalorder %v1366_v28, 0  ;;  %v958_v7 = vadd.s32 1, %v954_v61  ;;  %v407_v10 = vadd.s32 1, %v1359_v52  ;;  %v1631_v22 = vshll.u32 %v405_v63, 8 }
  0x9d   :  { %v816_v55 = vsel %vm1367_vm6, 0, %v1366_v28  ;;  %v87_v25 = vand.u32 2147483647, %v1623_v58  ;;  %v91_v16 = vshrl.u32 %v90_v12, 23  ;;  %v1634_v29 = vand.u32 3, %v851_v18 }
  0x9e   :  { %v817_v59 = vsub.s32 32, %v816_v55  ;;  %v821_v60 = vsub.s32 4294967266, %v816_v55  ;;  %v818_v0 = vshll.u32 %v809_v2, %v816_v55  ;;  %v959_v53 = vsel %vm957_vm7, %v958_v7, %v954_v61 }
  0x9f   :  { %v960_v19 = vadd.s32 %v959_v53, %v955_v11  ;;  %vm408_vm8 = vcmp.gt.s32.totalorder %v407_v10, 0  ;;  %vm864_vm9 = vcmp.lt.s32.totalorder %v1497_v23, 0  ;;  %vm1639_vm10 = vcmp.le.f32.partialorder %v862_v26, 0.7853982 }
  0xa0   :  { %v819_v6 = vshrl.u32 %v801_v54, %v817_v59  ;;  %v822_v56 = vadd.s32 127, %v821_v60  ;;  %v409_v21 = vsel %vm408_vm8, %v407_v10, 0  ;;  %v1643_v8 = vadd.s32 %v951_v47, %v932_v46 }
  0xa1   :  { %v961_v24 = vadd.s32 536870912, %v960_v19  ;;  %v411_v2 = vand.u32 31, %v409_v21  ;;  %v1646_v39 = vand.u32 65535, %v1631_v22  ;;  %v1649_v41 = vshrl.u32 %v1631_v22, 16 }
  0xa2   :  { %v820_v15 = vor.u32 %v819_v6, %v818_v0  ;;  %v823_v17 = vshll.u32 %v822_v56, 23  ;;  %v1651_v43 = vshrl.u32 %v409_v21, 5  ;;  %v1353_v44 = vadd.s32 4294967169, %v91_v16 }
  0xa3   :  { %v962_v30 = vshrl.u32 %v961_v24, 30  ;;  %v412_v33 = vsub.s32 32, %v411_v2  ;;  %v1655_v45 = vand.u32 8388607, %v87_v25  ;;  %v414_v48 = vshll.u32 %v1421_v32, %v411_v2 }
  0xa4   :  { %v824_v50 = vor.u32 4788187, %v823_v17  ;;  %v827_v20 = vcvt.s32.f32 %v820_v15  ;;  %v417_v57 = vshll.u32 %v1422_v34, %v411_v2  ;;  %v423_v60 = vshll.u32 %v1424_v38, %v411_v2 }
  0xa5   :  { %v963_v28 = vshll.u32 %v962_v30, 30  ;;  %v986_v42 = vsub.s32 4, %v962_v30  ;;  %v415_v46 = vshrl.u32 %v1422_v34, %v412_v33  ;;  %v418_v51 = vshrl.u32 %v1423_v36, %v412_v33 }
  0xa6   :  { %v825_v27 = vand.u32 2147483647, %v824_v50  ;;  %v424_v5 = vshrl.u32 %v1425_v40, %v412_v33  ;;  %v427_v54 = vshrl.u32 %v1426_v49, %v412_v33  ;;  %v421_v59 = vshrl.u32 %v1424_v38, %v412_v33 }
  0xa7   :  { %v1659_v47 = vsub.s32 %v960_v19, %v963_v28  ;;  %v426_v62 = vshll.u32 %v1425_v40, %v411_v2  ;;  %v987_v63 = vsel %vm864_vm9, %v986_v42, %v962_v30  ;;  %v416_v0 = vor.u32 %v415_v46, %v414_v48 }
  0xa8   :  { %v828_v35 = vmul.f32 %v827_v20, %v825_v27  ;;  %v420_v6 = vshll.u32 %v1423_v36, %v411_v2  ;;  %v419_v4 = vor.u32 %v418_v51, %v417_v57  ;;  %v425_v7 = vor.u32 %v424_v5, %v423_v60 }
  0xa9   :  { %vm965_vm11 = vcmp.lt.s32.totalorder %v1659_v47, 0  ;;  %v966_v61 = vsub.s32 0, %v1659_v47  ;;  %v428_v11 = vor.u32 %v427_v54, %v426_v62  ;;  %v989_v53 = vsel %vm1639_vm10, 0, %v987_v63 }
  0xaa   :  { %v829_v26 = vxor.u32 2147483648, %v828_v35  ;;  %v422_v17 = vor.u32 %v421_v59, %v420_v6  ;;  %v413_v18 = vshrl.u32 %v1421_v32, %v412_v33  ;;  %vm429_vm12 = vcmp.lt.s32.totalorder %v1651_v43, 1 }
  0xab   :  { %v967_v56 = vsel %vm965_vm11, %v966_v61, %v1659_v47  ;;  %v1687_v19 = vadd.s32 1, %v1353_v44  ;;  %vm432_vm13 = vcmp.lt.s32.totalorder %v1651_v43, 4  ;;  %vm431_vm14 = vcmp.lt.s32.totalorder %v1651_v43, 3 }
  0xac   :  { %v830_v55 = vsel %vm709_vm4, %v829_v26, %v828_v35  ;;  %v968_v15 = vclz %v967_v56  ;;  %v437_v2 = vsel %vm429_vm12, %v416_v0, %v419_v4  ;;  %v438_v16 = vsel %vm432_vm13, %v425_v7, 920167782 }
  0xad   :  { %v1672_v14 = vsel %vm1614_vm5, %v1489_v13, %v830_v55  ;;  %v442_v27 = vsel %vm432_vm13, %v428_v11, 1326507024  ;;  %v441_v33 = vsel %vm429_vm12, %v419_v4, %v422_v17  ;;  %v1699_v28 = vadd.s32 3, %v989_v53 }
  0xae   :  { %v835_v52 = vmul.f32 %v1672_v14, %v1672_v14  ;;  %v1369_v24 = vadd.s32 4294967294, %v968_v15  ;;  %v439_v44 = vsel %vm431_vm14, %v422_v17, %v438_v16  ;;  %v443_v26 = vsel %vm431_vm14, %v425_v7, %v442_v27 }
  0xaf   :  { %vm857_vm0 = vcmp.eq.s32.totalorder %v1634_v29, 2  ;;  %vm430_vm1 = vcmp.lt.s32.totalorder %v1651_v43, 2  ;;  %vm854_vm2 = vcmp.eq.s32.totalorder %v1634_v29, 0  ;;  %vm853_vm3 = vcmp.lt.s32.totalorder %v1634_v29, 2 }
  0xb0   :  { %v836_v10 = vmul.f32 -0.001358992, %v835_v52  ;;  %v843_v12 = vmul.f32 -0.00019511016, %v835_v52  ;;  %vm1370_vm15 = vcmp.lt.s32.totalorder %v1369_v24, 0  ;;  %v440_v54 = vsel %vm430_vm1, %v437_v2, %v439_v44 }
  0xb1   :  { %v971_v35 = vsel %vm1370_vm15, 0, %v1369_v24  ;;  %v444_v55 = vsel %vm430_vm1, %v441_v33, %v443_v26  ;;  %vm850_vm4 = vweird.f32 %v1489_v13  ;;  %v470_v6 = vand.u32 65535, %v440_v54 }
  0xb2   :  { %v837_v50 = vadd.f32 0.041655596, %v836_v10  ;;  %v844_v21 = vadd.f32 0.008332121, %v843_v12  ;;  %v972_v46 = vsub.s32 32, %v971_v35  ;;  %v973_v51 = vshll.u32 %v1659_v47, %v971_v35 }
  0xb3   :  { %v976_v5 = vsub.s32 4294967266, %v971_v35  ;;  %v448_v61 = vand.u32 65535, %v444_v55  ;;  %v434_v47 = vsel %vm432_vm13, %v422_v17, 2102212464  ;;  %v449_v63 = vshrl.u32 %v444_v55, 16 }
  0xb4   :  { %v838_v20 = vmul.f32 %v837_v50, %v835_v52  ;;  %v845_v30 = vmul.f32 %v844_v21, %v835_v52  ;;  %v974_v60 = vshrl.u32 %v1643_v8, %v972_v46  ;;  %v471_v10 = vshrl.u32 %v440_v54, 16 }
  0xb5   :  { %v977_v62 = vadd.s32 127, %v976_v5  ;;  %v451_v15 = vmul.u32 %v449_v63, %v1646_v39  ;;  %v452_v8 = vmul.u32 %v448_v61, %v1649_v41  ;;  %v435_v17 = vsel %vm431_vm14, %v419_v4, %v434_v47 }
  0xb6   :  { %v839_v42 = vadd.f32 -0.4999988, %v838_v20  ;;  %v846_v48 = vadd.f32 -0.16666654, %v845_v30  ;;  %v975_v11 = vor.u32 %v974_v60, %v973_v51  ;;  %v450_v21 = vmul.u32 %v448_v61, %v1646_v39 }
  0xb7   :  { %v978_v12 = vshll.u32 %v977_v62, 23  ;;  %v453_v16 = vmul.u32 %v449_v63, %v1649_v41  ;;  %v454_v27 = vshll.u32 %v451_v15, 16  ;;  %v456_v30 = vshll.u32 %v452_v8, 16 }
  0xb8   :  { %v840_v57 = vmul.f32 %v839_v42, %v835_v52  ;;  %v847_v59 = vmul.f32 %v846_v48, %v835_v52  ;;  %v433_v52 = vsel %vm429_vm12, %v413_v18, %v416_v0  ;;  %v982_v2 = vcvt.s32.f32 %v975_v11 }
  0xb9   :  { %v979_v24 = vor.u32 4788187, %v978_v12  ;;  %v472_v0 = vmul.u32 %v470_v6, %v1646_v39  ;;  %v473_v18 = vmul.u32 %v471_v10, %v1646_v39  ;;  %vm458_vm5 = vc.u32 %v450_v21, %v454_v27 }
  0xba   :  { %v841_v56 = vadd.f32 1.0, %v840_v57  ;;  %v848_v7 = vadd.f32 1.0, %v847_v59  ;;  %v460_v35 = vadd.s32 %v454_v27, %v450_v21  ;;  %v459_v44 = vsel %vm458_vm5, 1, %v1420_v3 }
  0xbb   :  { %v980_v33 = vand.u32 2147483647, %v979_v24  ;;  %v474_v26 = vmul.u32 %v470_v6, %v1649_v41  ;;  %v476_v42 = vshll.u32 %v473_v18, 16  ;;  %v461_v51 = vadd.s32 %v459_v44, %v453_v16 }
  0xbc   :  { %v849_v53 = vmul.f32 %v848_v7, %v1672_v14  ;;  %v858_v50 = vxor.u32 2147483648, %v841_v56  ;;  %vm462_vm6 = vc.u32 %v460_v35, %v456_v30  ;;  %v455_v5 = vshrl.u32 %v451_v15, 16 }
  0xbd   :  { %v983_v46 = vmul.f32 %v982_v2, %v980_v33  ;;  %v457_v54 = vshrl.u32 %v452_v8, 16  ;;  %v463_v55 = vsel %vm462_vm6, 1, %v1420_v3  ;;  %v475_v60 = vmul.u32 %v471_v10, %v1649_v41 }
  0xbe   :  { %v855_v20 = vxor.u32 2147483648, %v849_v53  ;;  %v859_v14 = vsel %vm857_vm0, %v858_v50, %v849_v53  ;;  %v465_v59 = vadd.s32 %v463_v55, %v461_v51  ;;  %vm480_vm7 = vc.u32 %v472_v0, %v476_v42 }
  0xbf   :  { %v984_v57 = vxor.u32 2147483648, %v983_v46  ;;  %v478_v61 = vshll.u32 %v474_v26, 16  ;;  %v481_v29 = vsel %vm480_vm7, 1, %v1420_v3  ;;  %v482_v62 = vadd.s32 %v476_v42, %v472_v0 }
  0xc0   :  { %v856_v4 = vsel %vm854_vm2, %v841_v56, %v855_v20  ;;  %vm98_vm8 = vcmp.gt.s32.totalorder %v1687_v19, 0  ;;  %v466_v47 = vadd.s32 %v465_v59, %v455_v5  ;;  %v483_v63 = vadd.s32 %v481_v29, %v475_v60 }
  0xc1   :  { %v860_v48 = vsel %vm853_vm3, %v856_v4, %v859_v14  ;;  %v985_v13 = vsel %vm864_vm9, %v984_v57, %v983_v46  ;;  %v99_v6 = vsel %vm98_vm8, %v1687_v19, 0  ;;  %v436_v41 = vsel %vm430_vm1, %v433_v52, %v435_v17 }
  0xc2   :  { %v861_v39 = vsel %vm850_vm4, nan, %v860_v48  ;;  %v988_v56 = vsel %vm1639_vm10, %v1497_v23, %v985_v13  ;;  %vm484_vm11 = vc.u32 %v482_v62, %v478_v61  ;;  %v95_v7 = vor.u32 8388608, %v1655_v45 }
  0xc3   :  { %1331 = vst [vmem:[#allocation2 + $0x20] sm:$0xff] %v861_v39  ;;  %v990_v11 = vmul.f32 %v988_v56, %v988_v56  ;;  %v1752_v10 = vadd.s32 %v466_v47, %v457_v54  ;;  %v485_v12 = vsel %vm484_vm11, 1, %v1420_v3  ;;  %v101_v15 = vand.u32 31, %v99_v6 }
  0xc4   :  { %v1756_v8 = vand.u32 3, %v1699_v28  ;;  %v477_v19 = vshrl.u32 %v473_v18, 16  ;;  %v1758_v53 = vadd.s32 %v482_v62, %v478_v61  ;;  %v487_v37 = vadd.s32 %v485_v12, %v483_v63 }
  0xc5   :  { %v991_v50 = vmul.f32 -0.001358992, %v990_v11  ;;  %v998_v21 = vmul.f32 -0.00019511016, %v990_v11  ;;  %v479_v43 = vshrl.u32 %v474_v26, 16  ;;  %v490_v52 = vmul.u32 %v1631_v22, %v436_v41 }
  0xc6   :  { %v488_v17 = vadd.s32 %v487_v37, %v477_v19  ;;  %vm492_vm9 = vc.u32 %v1752_v10, %v1758_v53  ;;  %v1763_v45 = vshrl.u32 %v99_v6, 5  ;;  %v1765_v24 = vsub.s32 32, %v101_v15 }
  0xc7   :  { %v992_v2 = vadd.f32 0.041655596, %v991_v50  ;;  %v999_v28 = vadd.f32 0.008332121, %v998_v21  ;;  %v104_v16 = vshll.u32 %v1421_v32, %v101_v15  ;;  %v107_v27 = vshll.u32 %v1422_v34, %v101_v15 }
  0xc8   :  { %v489_v20 = vadd.s32 %v488_v17, %v479_v43  ;;  %v105_v30 = vshrl.u32 %v1422_v34, %v1765_v24  ;;  %v108_v22 = vshrl.u32 %v1423_v36, %v1765_v24  ;;  %v113_v0 = vshll.u32 %v1424_v38, %v101_v15 }
  0xc9   :  { %v993_v18 = vmul.f32 %v992_v2, %v990_v11  ;;  %v1000_v14 = vmul.f32 %v999_v28, %v990_v11  ;;  %v111_v33 = vshrl.u32 %v1424_v38, %v1765_v24  ;;  %v114_v35 = vshrl.u32 %v1425_v40, %v1765_v24 }
  0xca   :  { %v493_v4 = vadd.s32 1, %v489_v20  ;;  %v1778_v44 = vor.u32 %v105_v30, %v104_v16  ;;  %v1780_v26 = vor.u32 %v108_v22, %v107_v27  ;;  %v110_v42 = vshll.u32 %v1423_v36, %v101_v15 }
  0xcb   :  { %v994_v48 = vadd.f32 -0.4999988, %v993_v18  ;;  %v1001_v46 = vadd.f32 -0.16666654, %v1000_v14  ;;  %v115_v51 = vor.u32 %v114_v35, %v113_v0  ;;  %vm119_vm10 = vcmp.lt.s32.totalorder %v1763_v45, 1 }
  0xcc   :  { %v494_v39 = vsel %vm492_vm9, %v493_v4, %v489_v20  ;;  %v112_v5 = vor.u32 %v111_v33, %v110_v42  ;;  %v116_v54 = vshll.u32 %v1425_v40, %v101_v15  ;;  %v117_v55 = vshrl.u32 %v1426_v49, %v1765_v24 }
  0xcd   :  { %v995_v57 = vmul.f32 %v994_v48, %v990_v11  ;;  %v1002_v59 = vmul.f32 %v1001_v46, %v990_v11  ;;  %v495_v60 = vadd.s32 %v494_v39, %v490_v52  ;;  %vm122_vm12 = vcmp.lt.s32.totalorder %v1763_v45, 4 }
  0xce   :  { %v118_v61 = vor.u32 %v117_v55, %v116_v54  ;;  %v127_v29 = vsel %vm119_vm10, %v1778_v44, %v1780_v26  ;;  %v128_v62 = vsel %vm122_vm12, %v115_v51, 920167782  ;;  %v1797_v13 = vshll.u32 %v95_v7, 8 }
  0xcf   :  { %v996_v47 = vadd.f32 1.0, %v995_v57  ;;  %v1003_v63 = vadd.f32 1.0, %v1002_v59  ;;  %v496_v6 = vadd.s32 536870912, %v495_v60  ;;  %vm121_vm13 = vcmp.lt.s32.totalorder %v1763_v45, 3 }
  0xd0   :  { %vm120_vm14 = vcmp.lt.s32.totalorder %v1763_v45, 2  ;;  %v129_v41 = vsel %vm121_vm13, %v112_v5, %v128_v62  ;;  %v131_v11 = vsel %vm119_vm10, %v1780_v26, %v112_v5  ;;  %v132_v12 = vsel %vm122_vm12, %v118_v61, 1326507024 }
  0xd1   :  { %v1004_v15 = vmul.f32 %v1003_v63, %v988_v56  ;;  %v1013_v7 = vxor.u32 2147483648, %v996_v47  ;;  %v1808_v19 = vshrl.u32 %v496_v6, 30  ;;  %v130_v37 = vsel %vm120_vm14, %v127_v29, %v129_v41 }
  0xd2   :  { %vm1008_vm15 = vcmp.lt.s32.totalorder %v1756_v8, 2  ;;  %v133_v50 = vsel %vm121_vm13, %v115_v51, %v132_v12  ;;  %v161_v21 = vshrl.u32 %v130_v37, 16  ;;  %vm1012_vm0 = vcmp.eq.s32.totalorder %v1756_v8, 2 }
  0xd3   :  { %v1010_v43 = vxor.u32 2147483648, %v1004_v15  ;;  %v498_v52 = vshll.u32 %v1808_v19, 30  ;;  %v136_v17 = vand.u32 65535, %v1797_v13  ;;  %vm1009_vm1 = vcmp.eq.s32.totalorder %v1756_v8, 0 }
  0xd4   :  { %v1014_v56 = vsel %vm1012_vm0, %v1013_v7, %v1004_v15  ;;  %v134_v2 = vsel %vm120_vm14, %v131_v11, %v133_v50  ;;  %v160_v28 = vand.u32 65535, %v130_v37  ;;  %vm1005_vm2 = vweird.f32 %v1497_v23  ;;  %v42_v37 = vpop.permute.xlu1 %41  ;;  %v32_v50 = vpop.permute.xlu0 %31 }
  0xd5   :  { %v1011_v16 = vsel %vm1009_vm1, %v996_v47, %v1010_v43  ;;  %v499_v27 = vsub.s32 %v495_v60, %v498_v52  ;;  %v138_v20 = vand.u32 65535, %v134_v2  ;;  %v1821_v30 = vmul.u32 %v161_v21, %v136_v17 }
  0xd6   :  { %v1015_v22 = vsel %vm1008_vm15, %v1011_v16, %v1014_v56  ;;  %v137_v0 = vshrl.u32 %v1797_v13, 16  ;;  %v139_v18 = vshrl.u32 %v134_v2, 16  ;;  %v103_v35 = vshrl.u32 %v1421_v32, %v1765_v24 }
  0xd7   :  { %v1016_v14 = vsel %vm1005_vm2, nan, %v1015_v22  ;;  %vm500_vm3 = vcmp.lt.s32.totalorder %v499_v27, 0  ;;  %v501_v33 = vsub.s32 0, %v499_v27  ;;  %v124_v4 = vsel %vm122_vm12, %v112_v5, 2102212464 }
  0xd8   :  { %1332 = vst [vmem:[#allocation2 + $0x28] sm:$0xff] %v1016_v14  ;;  %v141_v42 = vmul.u32 %v139_v18, %v136_v17  ;;  %v142_v48 = vmul.u32 %v138_v20, %v137_v0  ;;  %v491_v23 = vadd.s32 %v1758_v53, %v1752_v10  ;;  %v164_v46 = vmul.u32 %v160_v28, %v137_v0 }
  0xd9   :  { %v502_v8 = vsel %vm500_vm3, %v501_v33, %v499_v27  ;;  %v166_v51 = vshll.u32 %v1821_v30, 16  ;;  %v123_v54 = vsel %vm119_vm10, %v103_v35, %v1778_v44  ;;  %v140_v55 = vmul.u32 %v138_v20, %v136_v17 }
  0xda   :  { %v503_v39 = vclz %v502_v8  ;;  %v144_v57 = vshll.u32 %v141_v42, 16  ;;  %v125_v24 = vsel %vm121_vm13, %v1780_v26, %v124_v4  ;;  %v143_v5 = vmul.u32 %v139_v18, %v137_v0 }
  0xdb   :  { %v162_v59 = vmul.u32 %v160_v28, %v136_v17  ;;  %v165_v60 = vmul.u32 %v161_v21, %v137_v0  ;;  %v146_v10 = vshll.u32 %v142_v48, 16  ;;  %v168_v62 = vshll.u32 %v164_v46, 16 }
  0xdc   :  { %v1360_v61 = vadd.s32 4294967294, %v503_v39  ;;  %vm148_vm4 = vc.u32 %v140_v55, %v144_v57  ;;  %v150_v53 = vadd.s32 %v144_v57, %v140_v55  ;;  %v145_v15 = vshrl.u32 %v141_v42, 16 }
  0xdd   :  { %v149_v29 = vsel %vm148_vm4, 1, %v1420_v3  ;;  %vm170_vm5 = vc.u32 %v162_v59, %v166_v51  ;;  %v172_v47 = vadd.s32 %v166_v51, %v162_v59  ;;  %v147_v43 = vshrl.u32 %v142_v48, 16 }
  0xde   :  { %vm1361_vm6 = vcmp.lt.s32.totalorder %v1360_v61, 0  ;;  %v151_v44 = vadd.s32 %v149_v29, %v143_v5  ;;  %vm152_vm7 = vc.u32 %v150_v53, %v146_v10  ;;  %v171_v63 = vsel %vm170_vm5, 1, %v1420_v3 }
  0xdf   :  { %v506_v6 = vsel %vm1361_vm6, 0, %v1360_v61  ;;  %v153_v26 = vsel %vm152_vm7, 1, %v1420_v3  ;;  %v173_v41 = vadd.s32 %v171_v63, %v165_v60  ;;  %vm174_vm8 = vc.u32 %v172_v47, %v168_v62 }
  0xe0   :  { %v507_v11 = vsub.s32 32, %v506_v6  ;;  %v511_v12 = vsub.s32 4294967266, %v506_v6  ;;  %v155_v7 = vadd.s32 %v153_v26, %v151_v44  ;;  %v508_v21 = vshll.u32 %v499_v27, %v506_v6 }
  0xe1   :  { %v167_v52 = vshrl.u32 %v1821_v30, 16  ;;  %v175_v17 = vsel %vm174_vm8, 1, %v1420_v3  ;;  %v521_v20 = vsub.s32 4, %v1808_v19  ;;  %v169_v22 = vshrl.u32 %v164_v46, 16  ;;  %v1851_v30 = vld [vmem:[%s2351_s1] ss:$0 sm:$0xff] }
  0xe2   :  { %v509_v56 = vshrl.u32 %v491_v23, %v507_v11  ;;  %v512_v2 = vadd.s32 127, %v511_v12  ;;  %v156_v28 = vadd.s32 %v155_v7, %v145_v15  ;;  %v177_v16 = vadd.s32 %v175_v17, %v173_v41 }
  0xe3   :  { %v70_v0 = vmul.f32 %v1480_v9, %v42_v37  ;;  %v68_v18 = vmul.f32 %v1480_v9, %v32_v50  ;;  %v176_v4 = vadd.s32 %v172_v47, %v168_v62  ;;  %v126_v23 = vsel %vm120_vm14, %v123_v54, %v125_v24 }
  0xe4   :  { %v510_v14 = vor.u32 %v509_v56, %v508_v21  ;;  %v513_v33 = vshll.u32 %v512_v2, 23  ;;  %v157_v35 = vadd.s32 %v156_v28, %v147_v43  ;;  %v178_v27 = vadd.s32 %v177_v16, %v167_v52 }
  0xe5   :  { %v1854_v42 = vadd.f32 %v1851_v30, %v70_v0  ;;  %v1859_v9 = vadd.f32 %v1851_v30, %v68_v18  ;;  %vm399_vm11 = vcmp.lt.s32.totalorder %v1592_v1, 0  ;;  %v180_v45 = vmul.u32 %v1797_v13, %v126_v23 }
  0xe6   :  { %v514_v48 = vor.u32 4788187, %v513_v33  ;;  %v179_v8 = vadd.s32 %v178_v27, %v169_v22  ;;  %vm182_vm9 = vc.u32 %v157_v35, %v176_v4  ;;  %v517_v55 = vcvt.s32.f32 %v510_v14 }
  0xe7   :  { %v552_v46 = vand.u32 2147483647, %v1854_v42  ;;  %v555_v51 = vand.u32 2139095040, %v1854_v42  ;;  %v522_v57 = vsel %vm399_vm11, %v521_v20, %v1808_v19  ;;  %vm398_vm10 = vcmp.le.f32.partialorder %v397_v31, 0.7853982 }
  0xe8   :  { %v515_v39 = vand.u32 2147483647, %v514_v48  ;;  %v183_v5 = vadd.s32 1, %v179_v8  ;;  %v245_v61 = vand.u32 2139095040, %v1859_v9  ;;  %v524_v10 = vsel %vm398_vm10, 0, %v522_v57 }
  0xe9   :  { %v556_v54 = vshrl.u32 %v555_v51, 23  ;;  %v559_v24 = vand.u32 8388607, %v552_v46  ;;  %v541_v6 = vadd.s32 3, %v524_v10  ;;  %vm1882_vm13 = vcmp.le.f32.partialorder %v87_v25, 0.7853982 }
  0xea   :  { %v518_v59 = vmul.f32 %v517_v55, %v515_v39  ;;  %v184_v60 = vsel %vm182_vm9, %v183_v5, %v179_v8  ;;  %v246_v63 = vshrl.u32 %v245_v61, 23  ;;  %vm89_vm14 = vcmp.lt.s32.totalorder %v1623_v58, 0 }
  0xeb   :  { %v185_v53 = vadd.s32 %v184_v60, %v180_v45  ;;  %v1362_v29 = vadd.s32 4294967169, %v556_v54  ;;  %v560_v47 = vor.u32 8388608, %v559_v24  ;;  %v1888_v17 = vand.u32 3, %v541_v6 }
  0xec   :  { %v519_v62 = vxor.u32 2147483648, %v518_v59  ;;  %v1356_v21 = vadd.s32 4294967169, %v246_v63  ;;  %v181_v56 = vadd.s32 %v176_v4, %v157_v35  ;;  %v242_v28 = vand.u32 2147483647, %v1859_v9 }
  0xed   :  { %v186_v19 = vadd.s32 536870912, %v185_v53  ;;  %v562_v44 = vadd.s32 1, %v1362_v29  ;;  %v1886_v15 = vshll.u32 %v560_v47, 8  ;;  %vm547_vm0 = vcmp.eq.s32.totalorder %v1888_v17, 2 }
  0xee   :  { %v520_v13 = vsel %vm399_vm11, %v519_v62, %v518_v59  ;;  %v1906_v33 = vadd.s32 1, %v1356_v21  ;;  %vm544_vm1 = vcmp.eq.s32.totalorder %v1888_v17, 0  ;;  %vm543_vm2 = vcmp.lt.s32.totalorder %v1888_v17, 2 }
  0xef   :  { %v1876_v26 = vsel %vm398_vm10, %v1592_v1, %v520_v13  ;;  %v187_v31 = vshrl.u32 %v186_v19, 30  ;;  %vm563_vm12 = vcmp.gt.s32.totalorder %v562_v44, 0  ;;  %v1895_v22 = vand.u32 65535, %v1886_v15 }
  0xf0   :  { %v525_v41 = vmul.f32 %v1876_v26, %v1876_v26  ;;  %v564_v12 = vsel %vm563_vm12, %v562_v44, 0  ;;  %v1898_v0 = vshrl.u32 %v1886_v15, 16  ;;  %vm540_vm3 = vweird.f32 %v1592_v1 }
  0xf1   :  { %v188_v7 = vshll.u32 %v187_v31, 30  ;;  %v211_v37 = vsub.s32 4, %v187_v31  ;;  %v566_v50 = vand.u32 31, %v564_v12  ;;  %v1911_v8 = vshrl.u32 %v564_v12, 5 }
  0xf2   :  { %v526_v43 = vmul.f32 -0.001358992, %v525_v41  ;;  %v533_v52 = vmul.f32 -0.00019511016, %v525_v41  ;;  %vm253_vm4 = vcmp.gt.s32.totalorder %v1906_v33, 0 }
  0xf3   :  { %v1891_v2 = vsub.s32 %v185_v53, %v188_v7  ;;  %v567_v25 = vsub.s32 32, %v566_v50  ;;  %v1904_v14 = vsel %vm89_vm14, %v211_v37, %v187_v31  ;;  %v569_v51 = vshll.u32 %v1421_v32, %v566_v50 }
  0xf4   :  { %v527_v16 = vadd.f32 0.041655596, %v526_v43  ;;  %v534_v20 = vadd.f32 0.008332121, %v533_v52  ;;  %v572_v39 = vshll.u32 %v1422_v34, %v566_v50  ;;  %v214_v54 = vsel %vm1882_vm13, 0, %v1904_v14 }
  0xf5   :  { %vm190_vm15 = vcmp.lt.s32.totalorder %v1891_v2, 0  ;;  %v191_v18 = vsub.s32 0, %v1891_v2  ;;  %v570_v4 = vshrl.u32 %v1422_v34, %v567_v25  ;;  %v573_v48 = vshrl.u32 %v1423_v36, %v567_v25 }
  0xf6   :  { %v528_v35 = vmul.f32 %v527_v16, %v525_v41  ;;  %v535_v27 = vmul.f32 %v534_v20, %v525_v41  ;;  %v576_v45 = vshrl.u32 %v1424_v38, %v567_v25  ;;  %v568_v24 = vshrl.u32 %v1421_v32, %v567_v25 }
  0xf7   :  { %v192_v23 = vsel %vm190_vm15, %v191_v18, %v1891_v2  ;;  %v571_v59 = vor.u32 %v570_v4, %v569_v51  ;;  %v575_v60 = vshll.u32 %v1423_v36, %v566_v50  ;;  %v574_v29 = vor.u32 %v573_v48, %v572_v39 }
  0xf8   :  { %v529_v55 = vadd.f32 -0.4999988, %v528_v35  ;;  %v536_v57 = vadd.f32 -0.16666654, %v535_v27  ;;  %v193_v5 = vclz %v192_v23  ;;  %v578_v62 = vshll.u32 %v1424_v38, %v566_v50 }
  0xf9   :  { %v579_v47 = vshrl.u32 %v1425_v40, %v567_v25  ;;  %v581_v19 = vshll.u32 %v1425_v40, %v566_v50  ;;  %v582_v44 = vshrl.u32 %v1426_v49, %v567_v25  ;;  %v577_v6 = vor.u32 %v576_v45, %v575_v60 }
  0xfa   :  { %v530_v61 = vmul.f32 %v529_v55, %v525_v41  ;;  %v537_v10 = vmul.f32 %v536_v57, %v525_v41  ;;  %v1354_v53 = vadd.s32 4294967294, %v193_v5  ;;  %vm584_vm6 = vcmp.lt.s32.totalorder %v1911_v8, 1 }
  0xfb   :  { %v580_v41 = vor.u32 %v579_v47, %v578_v62  ;;  %v583_v12 = vor.u32 %v582_v44, %v581_v19  ;;  %vm585_vm7 = vcmp.lt.s32.totalorder %v1911_v8, 2  ;;  %vm586_vm8 = vcmp.lt.s32.totalorder %v1911_v8, 3 }
  0xfc   :  { %v531_v63 = vadd.f32 1.0, %v530_v61  ;;  %v538_v13 = vadd.f32 1.0, %v537_v10  ;;  %vm1355_vm5 = vcmp.lt.s32.totalorder %v1354_v53, 0  ;;  %vm587_vm11 = vcmp.lt.s32.totalorder %v1911_v8, 4 }
  0xfd   :  { %v196_v31 = vsel %vm1355_vm5, 0, %v1354_v53  ;;  %v588_v16 = vsel %vm584_vm6, %v568_v24, %v571_v59  ;;  %v589_v20 = vsel %vm587_vm11, %v577_v6, 2102212464  ;;  %v593_v14 = vsel %vm587_vm11, %v580_v41, 920167782 }
  0xfe   :  { %v539_v7 = vmul.f32 %v538_v13, %v1876_v26  ;;  %v548_v37 = vxor.u32 2147483648, %v531_v63  ;;  %v197_v21 = vsub.s32 32, %v196_v31  ;;  %v198_v50 = vshll.u32 %v1891_v2, %v196_v31 }
  0xff   :  { %v201_v43 = vsub.s32 4294967266, %v196_v31  ;;  %v592_v2 = vsel %vm584_vm6, %v571_v59, %v574_v29  ;;  %v590_v27 = vsel %vm586_vm8, %v574_v29, %v589_v20  ;;  %v594_v4 = vsel %vm586_vm8, %v577_v6, %v593_v14 }
 0x100   :  { %v545_v52 = vxor.u32 2147483648, %v539_v7  ;;  %v199_v25 = vshrl.u32 %v181_v56, %v197_v21  ;;  %v549_v26 = vsel %vm547_vm0, %v548_v37, %v539_v7  ;;  %v595_v51 = vsel %vm585_vm7, %v592_v2, %v594_v4 }
 0x101   :  { %v202_v18 = vadd.s32 127, %v201_v43  ;;  %v596_v39 = vsel %vm584_vm6, %v574_v29, %v577_v6  ;;  %v231_v57 = vadd.s32 3, %v214_v54  ;;  %v597_v5 = vsel %vm587_vm11, %v583_v12, 1326507024 }
 0x102   :  { %v546_v35 = vsel %vm544_vm1, %v531_v63, %v545_v52  ;;  %v200_v56 = vor.u32 %v199_v25, %v198_v50  ;;  %v625_v45 = vand.u32 65535, %v595_v51  ;;  %v1964_v17 = vsel %vm585_vm7, %v588_v16, %v590_v27 }
 0x103   :  { %v550_v48 = vsel %vm543_vm2, %v546_v35, %v549_v26  ;;  %v203_v23 = vshll.u32 %v202_v18, 23  ;;  %v598_v59 = vsel %vm586_vm8, %v580_v41, %v597_v5  ;;  %v626_v60 = vshrl.u32 %v595_v51, 16 }
 0x104   :  { %v551_v55 = vsel %vm540_vm3, nan, %v550_v48  ;;  %v207_v61 = vcvt.s32.f32 %v200_v56  ;;  %v599_v1 = vsel %vm585_vm7, %v596_v39, %v598_v59  ;;  %v629_v54 = vmul.u32 %v625_v45, %v1898_v0 }
 0x105   :  { %1329 = vst [vmem:[#allocation2 + $0x10] sm:$0xff] %v551_v55  ;;  %v204_v24 = vor.u32 4788187, %v203_v23  ;;  %v254_v10 = vsel %vm253_vm4, %v1906_v33, 0  ;;  %v603_v29 = vand.u32 65535, %v599_v1  ;;  %v604_v62 = vshrl.u32 %v599_v1, 16 }
 0x106   :  { %v628_v47 = vmul.u32 %v626_v60, %v1895_v22  ;;  %v1975_v19 = vand.u32 3, %v231_v57  ;;  %v645_v44 = vmul.u32 %v1886_v15, %v1964_v17  ;;  %v1981_v8 = vand.u32 8388607, %v242_v28 }
 0x107   :  { %v205_v53 = vand.u32 2147483647, %v204_v24  ;;  %v606_v13 = vmul.u32 %v604_v62, %v1895_v22  ;;  %v607_v6 = vmul.u32 %v603_v29, %v1898_v0  ;;  %v627_v33 = vmul.u32 %v625_v45, %v1895_v22 }
 0x108   :  { %v630_v31 = vmul.u32 %v626_v60, %v1898_v0  ;;  %v631_v41 = vshll.u32 %v628_v47, 16  ;;  %v633_v12 = vshll.u32 %v629_v54, 16  ;;  %v256_v7 = vand.u32 31, %v254_v10 }
 0x109   :  { %v208_v63 = vmul.f32 %v207_v61, %v205_v53  ;;  %v605_v21 = vmul.u32 %v603_v29, %v1895_v22  ;;  %v608_v50 = vmul.u32 %v604_v62, %v1898_v0  ;;  %v609_v43 = vshll.u32 %v606_v13, 16 }
 0x10a   :  { %v611_v52 = vshll.u32 %v607_v6, 16  ;;  %vm635_vm9 = vc.u32 %v627_v33, %v631_v41  ;;  %v637_v25 = vadd.s32 %v631_v41, %v627_v33  ;;  %v1989_v16 = vsub.s32 32, %v256_v7 }
 0x10b   :  { %v209_v37 = vxor.u32 2147483648, %v208_v63  ;;  %vm613_vm10 = vc.u32 %v605_v21, %v609_v43  ;;  %v615_v26 = vadd.s32 %v609_v43, %v605_v21  ;;  %v636_v18 = vsel %vm635_vm9, 1, %v1420_v3 }
 0x10c   :  { %v614_v22 = vsel %vm613_vm10, 1, %v1420_v3  ;;  %v638_v0 = vadd.s32 %v636_v18, %v630_v31  ;;  %vm639_vm12 = vc.u32 %v637_v25, %v633_v12  ;;  %v632_v4 = vshrl.u32 %v628_v47, 16 }
 0x10d   :  { %v210_v20 = vsel %vm89_vm14, %v209_v37, %v208_v63  ;;  %v616_v35 = vadd.s32 %v614_v22, %v608_v50  ;;  %vm617_vm15 = vc.u32 %v615_v26, %v611_v52  ;;  %v640_v56 = vsel %vm639_vm12, 1, %v1420_v3 }
 0x10e   :  { %v213_v2 = vsel %vm1882_vm13, %v1623_v58, %v210_v20  ;;  %v618_v27 = vsel %vm617_vm15, 1, %v1420_v3  ;;  %v634_v48 = vshrl.u32 %v629_v54, 16  ;;  %v642_v23 = vadd.s32 %v640_v56, %v638_v0 }
 0x10f   :  { %v215_v14 = vmul.f32 %v213_v2, %v213_v2  ;;  %v610_v55 = vshrl.u32 %v606_v13, 16  ;;  %v620_v57 = vadd.s32 %v618_v27, %v616_v35  ;;  %v612_v11 = vshrl.u32 %v607_v6, 16 }
 0x110   :  { %v2000_v5 = vadd.s32 %v637_v25, %v633_v12  ;;  %v643_v45 = vadd.s32 %v642_v23, %v632_v4  ;;  %v2002_v24 = vshrl.u32 %v254_v10, 5  ;;  %v260_v1 = vshrl.u32 %v1422_v34, %v1989_v16 }
 0x111   :  { %v216_v51 = vmul.f32 -0.001358992, %v215_v14  ;;  %v223_v39 = vmul.f32 -0.00019511016, %v215_v14  ;;  %v621_v61 = vadd.s32 %v620_v57, %v610_v55  ;;  %v259_v54 = vshll.u32 %v1421_v32, %v256_v7 }
 0x112   :  { %v644_v53 = vadd.s32 %v643_v45, %v634_v48  ;;  %v262_v29 = vshll.u32 %v1422_v34, %v256_v7  ;;  %v263_v62 = vshrl.u32 %v1423_v36, %v1989_v16  ;;  %v265_v10 = vshll.u32 %v1423_v36, %v256_v7 }
 0x113   :  { %v217_v59 = vadd.f32 0.041655596, %v216_v51  ;;  %v224_v60 = vadd.f32 0.008332121, %v223_v39  ;;  %v2010_v13 = vadd.s32 %v621_v61, %v612_v11  ;;  %v266_v33 = vshrl.u32 %v1424_v38, %v1989_v16 }
 0x114   :  { %v648_v6 = vadd.s32 1, %v644_v53  ;;  %v268_v31 = vshll.u32 %v1424_v38, %v256_v7  ;;  %v269_v41 = vshrl.u32 %v1425_v40, %v1989_v16  ;;  %v261_v21 = vor.u32 %v260_v1, %v259_v54 }
 0x115   :  { %v218_v47 = vmul.f32 %v217_v59, %v215_v14  ;;  %v225_v63 = vmul.f32 %v224_v60, %v215_v14  ;;  %vm647_vm13 = vc.u32 %v2010_v13, %v2000_v5  ;;  %v271_v52 = vshll.u32 %v1425_v40, %v256_v7 }
 0x116   :  { %v649_v50 = vsel %vm647_vm13, %v648_v6, %v644_v53  ;;  %v270_v43 = vor.u32 %v269_v41, %v268_v31  ;;  %v272_v25 = vshrl.u32 %v1426_v49, %v1989_v16  ;;  %v2026_v22 = vor.u32 %v263_v62, %v262_v29 }
 0x117   :  { %v219_v12 = vadd.f32 -0.4999988, %v218_v47  ;;  %v226_v37 = vadd.f32 -0.16666654, %v225_v63  ;;  %v650_v18 = vadd.s32 %v649_v50, %v645_v44  ;;  %vm230_vm14 = vweird.f32 %v1623_v58 }
 0x118   :  { %v250_v0 = vor.u32 8388608, %v1981_v8  ;;  %v2030_v35 = vor.u32 %v266_v33, %v265_v10  ;;  %v273_v56 = vor.u32 %v272_v25, %v271_v52  ;;  %vm277_vm0 = vcmp.lt.s32.totalorder %v2002_v24, 4 }
 0x119   :  { %v220_v20 = vmul.f32 %v219_v12, %v215_v14  ;;  %v227_v26 = vmul.f32 %v226_v37, %v215_v14  ;;  %v651_v4 = vadd.s32 536870912, %v650_v18  ;;  %vm233_vm1 = vcmp.lt.s32.totalorder %v1975_v19, 2 }
 0x11a   :  { %vm274_vm2 = vcmp.lt.s32.totalorder %v2002_v24, 1  ;;  %vm276_vm3 = vcmp.lt.s32.totalorder %v2002_v24, 3  ;;  %v283_v15 = vsel %vm277_vm0, %v270_v43, 920167782  ;;  %v287_v51 = vsel %vm277_vm0, %v273_v56, 1326507024 }
 0x11b   :  { %v221_v27 = vadd.f32 1.0, %v220_v20  ;;  %v228_v7 = vadd.f32 1.0, %v227_v26  ;;  %v2038_v8 = vshrl.u32 %v651_v4, 30  ;;  %v282_v14 = vsel %vm274_vm2, %v261_v21, %v2026_v22 }
 0x11c   :  { %v284_v48 = vsel %vm276_vm3, %v2030_v35, %v283_v15  ;;  %v286_v23 = vsel %vm274_vm2, %v2026_v22, %v2030_v35  ;;  %vm237_vm4 = vcmp.eq.s32.totalorder %v1975_v19, 2  ;;  %vm275_vm5 = vcmp.lt.s32.totalorder %v2002_v24, 2 }
 0x11d   :  { %v229_v17 = vmul.f32 %v228_v7, %v213_v2  ;;  %v238_v44 = vxor.u32 2147483648, %v221_v27  ;;  %v2052_v2 = vshll.u32 %v250_v0, 8  ;;  %v653_v55 = vshll.u32 %v2038_v8, 30 }
 0x11e   :  { %vm234_vm6 = vcmp.eq.s32.totalorder %v1975_v19, 0  ;;  %v285_v11 = vsel %vm275_vm5, %v282_v14, %v284_v48  ;;  %v288_v45 = vsel %vm276_vm3, %v270_v43, %v287_v51  ;;  %v258_v31 = vshrl.u32 %v1421_v32, %v1989_v16  ;;  %v62_v48 = vpop.permute.xlu1 %61 }
 0x11f   :  { %v235_v39 = vxor.u32 2147483648, %v229_v17  ;;  %v239_v57 = vsel %vm237_vm4, %v238_v44, %v229_v17  ;;  %v654_v60 = vsub.s32 %v650_v18, %v653_v55  ;;  %v289_v61 = vsel %vm275_vm5, %v286_v23, %v288_v45 }
 0x120   :  { %v291_v1 = vand.u32 65535, %v2052_v2  ;;  %v292_v54 = vshrl.u32 %v2052_v2, 16  ;;  %v293_v29 = vand.u32 65535, %v289_v61  ;;  %v294_v62 = vshrl.u32 %v289_v61, 16 }
 0x121   :  { %v236_v59 = vsel %vm234_vm6, %v221_v27, %v235_v39  ;;  %vm655_vm7 = vcmp.lt.s32.totalorder %v654_v60, 0  ;;  %v656_v63 = vsub.s32 0, %v654_v60  ;;  %v315_v41 = vand.u32 65535, %v285_v11 }
 0x122   :  { %v240_v53 = vsel %vm233_vm1, %v236_v59, %v239_v57  ;;  %v296_v10 = vmul.u32 %v294_v62, %v291_v1  ;;  %v297_v6 = vmul.u32 %v293_v29, %v292_v54  ;;  %v316_v12 = vshrl.u32 %v285_v11, 16  ;;  %v57_v59 = vpop.permute.xlu0 %56 }
 0x123   :  { %v241_v47 = vsel %vm230_vm14, nan, %v240_v53  ;;  %v657_v33 = vsel %vm655_vm7, %v656_v63, %v654_v60  ;;  %v295_v37 = vmul.u32 %v293_v29, %v291_v1  ;;  %v646_v43 = vadd.s32 %v2000_v5, %v2010_v13  ;;  %v1393_v53 = vld [vmem:[%s2350_s0] ss:$0 sm:$0xff] }
 0x124   :  { %1327 = vst [vmem:[#allocation2] sm:$0xff] %v241_v47  ;;  %v658_v19 = vclz %v657_v33  ;;  %v299_v50 = vshll.u32 %v296_v10, 16  ;;  %v278_v58 = vsel %vm274_vm2, %v258_v31, %v261_v21  ;;  %v298_v52 = vmul.u32 %v294_v62, %v292_v54 }
 0x125   :  { %v301_v20 = vshll.u32 %v297_v6, 16  ;;  %vm554_vm11 = vcmp.lt.s32.totalorder %v1854_v42, 0  ;;  %v676_v16 = vsub.s32 4, %v2038_v8  ;;  %v318_v0 = vmul.u32 %v316_v12, %v291_v1 }
 0x126   :  { %v1363_v25 = vadd.s32 4294967294, %v658_v19  ;;  %vm303_vm8 = vc.u32 %v295_v37, %v299_v50  ;;  %v305_v26 = vadd.s32 %v299_v50, %v295_v37  ;;  %v319_v56 = vmul.u32 %v315_v41, %v292_v54 }
 0x127   :  { %v304_v18 = vsel %vm303_vm8, 1, %v1420_v3  ;;  %v300_v27 = vshrl.u32 %v296_v10, 16  ;;  %v317_v21 = vmul.u32 %v315_v41, %v291_v1  ;;  %v321_v4 = vshll.u32 %v318_v0, 16 }
 0x128   :  { %vm1364_vm9 = vcmp.lt.s32.totalorder %v1363_v25, 0  ;;  %v306_v7 = vadd.s32 %v304_v18, %v298_v52  ;;  %vm307_vm10 = vc.u32 %v305_v26, %v301_v20  ;;  %v320_v14 = vmul.u32 %v316_v12, %v292_v54 }
 0x129   :  { %v661_v5 = vsel %vm1364_vm9, 0, %v1363_v25  ;;  %v308_v13 = vsel %vm307_vm10, 1, %v1420_v3  ;;  %v323_v51 = vshll.u32 %v319_v56, 16  ;;  %vm325_vm12 = vc.u32 %v317_v21, %v321_v4 }
 0x12a   :  { %v662_v15 = vsub.s32 32, %v661_v5  ;;  %v666_v17 = vsub.s32 4294967266, %v661_v5  ;;  %v310_v44 = vadd.s32 %v308_v13, %v306_v7  ;;  %v663_v23 = vshll.u32 %v654_v60, %v661_v5 }
 0x12b   :  { %v327_v39 = vadd.s32 %v321_v4, %v317_v21  ;;  %v326_v45 = vsel %vm325_vm12, 1, %v1420_v3  ;;  %v279_v61 = vsel %vm277_vm0, %v2030_v35, 2102212464  ;;  %v74_v60 = vmul.f32 %v1393_v53, %v62_v48 }
 0x12c   :  { %v664_v55 = vshrl.u32 %v646_v43, %v662_v15  ;;  %v667_v57 = vadd.s32 127, %v666_v17  ;;  %v311_v11 = vadd.s32 %v310_v44, %v300_v27  ;;  %v328_v1 = vadd.s32 %v326_v45, %v320_v14 }
 0x12d   :  { %vm329_vm15 = vc.u32 %v327_v39, %v323_v51  ;;  %v302_v62 = vshrl.u32 %v297_v6, 16  ;;  %v322_v63 = vshrl.u32 %v318_v0, 16  ;;  %v2089_v33 = vadd.f32 %v1851_v30, %v74_v60 }
 0x12e   :  { %v665_v54 = vor.u32 %v664_v55, %v663_v23  ;;  %v668_v29 = vshll.u32 %v667_v57, 23  ;;  %v330_v47 = vsel %vm329_vm15, 1, %v1420_v3  ;;  %v73_v31 = vmul.f32 %v1393_v53, %v57_v59 }
 0x12f   :  { %v332_v10 = vadd.s32 %v330_v47, %v328_v1  ;;  %v677_v35 = vsel %vm554_vm11, %v676_v16, %v2038_v8  ;;  %v280_v12 = vsel %vm276_vm3, %v2026_v22, %v279_v61  ;;  %v312_v19 = vadd.s32 %v311_v11, %v302_v62 }
 0x130   :  { %v669_v41 = vor.u32 4788187, %v668_v29  ;;  %v324_v37 = vshrl.u32 %v319_v56, 16  ;;  %v1172_v50 = vand.u32 2147483647, %v2089_v33  ;;  %v1175_v43 = vand.u32 2139095040, %v2089_v33 }
 0x131   :  { %v333_v6 = vadd.s32 %v332_v10, %v322_v63  ;;  %v672_v25 = vcvt.s32.f32 %v665_v54  ;;  %v331_v20 = vadd.s32 %v327_v39, %v323_v51  ;;  %v2100_v26 = vadd.f32 %v1851_v30, %v73_v31 }
 0x132   :  { %v670_v52 = vand.u32 2147483647, %v669_v41  ;;  %v281_v8 = vsel %vm275_vm5, %v278_v58, %v280_v12  ;;  %v1176_v18 = vshrl.u32 %v1175_v43, 23  ;;  %v1179_v22 = vand.u32 8388607, %v1172_v50 }
 0x133   :  { %v334_v16 = vadd.s32 %v333_v6, %v324_v37  ;;  %vm2108_vm13 = vcmp.le.f32.partialorder %v552_v46, 0.7853982  ;;  %vm337_vm14 = vc.u32 %v312_v19, %v331_v20  ;;  %v1020_v27 = vand.u32 2139095040, %v2100_v26 }
 0x134   :  { %v673_v56 = vmul.f32 %v672_v25, %v670_v52  ;;  %v679_v30 = vsel %vm2108_vm13, 0, %v677_v35  ;;  %v1374_v58 = vadd.s32 4294967169, %v1176_v18  ;;  %v1180_v7 = vor.u32 8388608, %v1179_v22 }
 0x135   :  { %v338_v24 = vadd.s32 1, %v334_v16  ;;  %v335_v13 = vmul.u32 %v2052_v2, %v281_v8  ;;  %v1021_v15 = vshrl.u32 %v1020_v27, 23  ;;  %v696_v17 = vadd.s32 3, %v679_v30 }
 0x136   :  { %v674_v5 = vxor.u32 2147483648, %v673_v56  ;;  %v1182_v4 = vadd.s32 1, %v1374_v58  ;;  %v2121_v48 = vshll.u32 %v1180_v7, 8  ;;  %vm244_vm1 = vcmp.lt.s32.totalorder %v1859_v9, 0 }
 0x137   :  { %v339_v21 = vsel %vm337_vm14, %v338_v24, %v334_v16  ;;  %v1371_v55 = vadd.s32 4294967169, %v1021_v15  ;;  %v2124_v45 = vand.u32 3, %v696_v17  ;;  %vm2128_vm2 = vcmp.le.f32.partialorder %v242_v28, 0.7853982 }
 0x138   :  { %v675_v46 = vsel %vm554_vm11, %v674_v5, %v673_v56  ;;  %v340_v44 = vadd.s32 %v339_v21, %v335_v13  ;;  %vm1183_vm0 = vcmp.gt.s32.totalorder %v1182_v4, 0  ;;  %v2132_v1 = vadd.s32 %v331_v20, %v312_v19 }
 0x139   :  { %v678_v14 = vsel %vm2108_vm13, %v1854_v42, %v675_v46  ;;  %v1184_v39 = vsel %vm1183_vm0, %v1182_v4, 0  ;;  %v2135_v60 = vand.u32 65535, %v2121_v48  ;;  %v1017_v54 = vand.u32 2147483647, %v2100_v26 }
 0x13a   :  { %v680_v23 = vmul.f32 %v678_v14, %v678_v14  ;;  %v341_v51 = vadd.s32 536870912, %v340_v44  ;;  %v1186_v2 = vand.u32 31, %v1184_v39  ;;  %v2139_v63 = vshrl.u32 %v2121_v48, 16 }
 0x13b   :  { %v2141_v31 = vshrl.u32 %v1184_v39, 5  ;;  %v2144_v41 = vadd.s32 1, %v1371_v55  ;;  %vm702_vm3 = vcmp.eq.s32.totalorder %v2124_v45, 2  ;;  %vm699_vm5 = vcmp.eq.s32.totalorder %v2124_v45, 0 }
 0x13c   :  { %v681_v57 = vmul.f32 -0.001358992, %v680_v23  ;;  %v688_v11 = vmul.f32 -0.00019511016, %v680_v23  ;;  %v342_v59 = vshrl.u32 %v341_v51, 30  ;;  %v1187_v53 = vsub.s32 32, %v1186_v2 }
 0x13d   :  { %v1189_v37 = vshll.u32 %v1421_v32, %v1186_v2  ;;  %v1192_v6 = vshll.u32 %v1422_v34, %v1186_v2  ;;  %v1195_v52 = vshll.u32 %v1423_v36, %v1186_v2  ;;  %vm698_vm6 = vcmp.lt.s32.totalorder %v2124_v45, 2 }
 0x13e   :  { %v682_v29 = vadd.f32 0.041655596, %v681_v57  ;;  %v689_v62 = vadd.f32 0.008332121, %v688_v11  ;;  %v343_v47 = vshll.u32 %v342_v59, 30  ;;  %v366_v10 = vsub.s32 4, %v342_v59 }
 0x13f   :  { %v1190_v28 = vshrl.u32 %v1422_v34, %v1187_v53  ;;  %v1193_v43 = vshrl.u32 %v1423_v36, %v1187_v53  ;;  %v1196_v25 = vshrl.u32 %v1424_v38, %v1187_v53  ;;  %v1188_v22 = vshrl.u32 %v1421_v32, %v1187_v53 }
 0x140   :  { %v683_v35 = vmul.f32 %v682_v29, %v680_v23  ;;  %v690_v12 = vmul.f32 %v689_v62, %v680_v23  ;;  %v2146_v19 = vsub.s32 %v340_v44, %v343_v47  ;;  %v367_v18 = vsel %vm244_vm1, %v366_v10, %v342_v59 }
 0x141   :  { %v1191_v0 = vor.u32 %v1190_v28, %v1189_v37  ;;  %v1199_v56 = vshrl.u32 %v1425_v40, %v1187_v53  ;;  %v1202_v58 = vshrl.u32 %v1426_v49, %v1187_v53  ;;  %vm695_vm7 = vweird.f32 %v1854_v42 }
 0x142   :  { %v684_v20 = vadd.f32 -0.4999988, %v683_v35  ;;  %v691_v8 = vadd.f32 -0.16666654, %v690_v12  ;;  %vm345_vm4 = vcmp.lt.s32.totalorder %v2146_v19, 0  ;;  %v346_v16 = vsub.s32 0, %v2146_v19 }
 0x143   :  { %v1197_v5 = vor.u32 %v1196_v25, %v1195_v52  ;;  %v1198_v13 = vshll.u32 %v1424_v38, %v1186_v2  ;;  %v1201_v21 = vshll.u32 %v1425_v40, %v1186_v2  ;;  %v369_v46 = vsel %vm2128_vm2, 0, %v367_v18 }
 0x144   :  { %v685_v27 = vmul.f32 %v684_v20, %v680_v23  ;;  %v692_v30 = vmul.f32 %v691_v8, %v680_v23  ;;  %v347_v24 = vsel %vm345_vm4, %v346_v16, %v2146_v19  ;;  %v1194_v17 = vor.u32 %v1193_v43, %v1192_v6 }
 0x145   :  { %v348_v7 = vclz %v347_v24  ;;  %v1200_v23 = vor.u32 %v1199_v56, %v1198_v13  ;;  %v1203_v51 = vor.u32 %v1202_v58, %v1201_v21  ;;  %vm1204_vm8 = vcmp.lt.s32.totalorder %v2141_v31, 1 }
 0x146   :  { %v686_v4 = vadd.f32 1.0, %v685_v27  ;;  %v693_v15 = vadd.f32 1.0, %v692_v30  ;;  %vm1205_vm11 = vcmp.lt.s32.totalorder %v2141_v31, 2  ;;  %vm1207_vm9 = vcmp.lt.s32.totalorder %v2141_v31, 4 }
 0x147   :  { %v1357_v44 = vadd.s32 4294967294, %v348_v7  ;;  %vm1206_vm12 = vcmp.lt.s32.totalorder %v2141_v31, 3  ;;  %v1208_v2 = vsel %vm1204_vm8, %v1188_v22, %v1191_v0  ;;  %v1209_v57 = vsel %vm1207_vm9, %v1197_v5, 2102212464 }
 0x148   :  { %v694_v39 = vmul.f32 %v693_v15, %v678_v14  ;;  %v703_v55 = vxor.u32 2147483648, %v686_v4  ;;  %v1212_v14 = vsel %vm1204_vm8, %v1191_v0, %v1194_v17  ;;  %v1210_v10 = vsel %vm1206_vm12, %v1194_v17, %v1209_v57 }
 0x149   :  { %vm1358_vm10 = vcmp.lt.s32.totalorder %v1357_v44, 0  ;;  %v1213_v35 = vsel %vm1207_vm9, %v1200_v23, 920167782  ;;  %v1216_v12 = vsel %vm1204_vm8, %v1194_v17, %v1197_v5  ;;  %v1217_v37 = vsel %vm1207_vm9, %v1203_v51, 1326507024 }
 0x14a   :  { %v700_v11 = vxor.u32 2147483648, %v694_v39  ;;  %v704_v59 = vsel %vm702_vm3, %v703_v55, %v694_v39  ;;  %v351_v53 = vsel %vm1358_vm10, 0, %v1357_v44  ;;  %v1214_v52 = vsel %vm1206_vm12, %v1197_v5, %v1213_v35 }
 0x14b   :  { %v352_v29 = vsub.s32 32, %v351_v53  ;;  %v353_v62 = vshll.u32 %v2146_v19, %v351_v53  ;;  %v356_v47 = vsub.s32 4294967266, %v351_v53  ;;  %v2201_v20 = vsel %vm1205_vm11, %v1208_v2, %v1210_v10 }
 0x14c   :  { %v701_v28 = vsel %vm699_vm5, %v686_v4, %v700_v11  ;;  %v1215_v8 = vsel %vm1205_vm11, %v1212_v14, %v1214_v52  ;;  %v1218_v45 = vsel %vm1206_vm12, %v1200_v23, %v1217_v37  ;;  %vm1028_vm15 = vcmp.gt.s32.totalorder %v2144_v41, 0 }
 0x14d   :  { %v705_v6 = vsel %vm698_vm6, %v701_v28, %v704_v59  ;;  %v354_v19 = vshrl.u32 %v2132_v1, %v352_v29  ;;  %v357_v43 = vadd.s32 127, %v356_v47  ;;  %v1219_v18 = vsel %vm1205_vm11, %v1216_v12, %v1218_v45 }
 0x14e   :  { %v706_v25 = vsel %vm695_vm7, nan, %v705_v6  ;;  %v1245_v22 = vand.u32 65535, %v1215_v8  ;;  %v1223_v0 = vand.u32 65535, %v1219_v18  ;;  %v1224_v42 = vshrl.u32 %v1219_v18, 16 }
 0x14f   :  { %1330 = vst [vmem:[#allocation2 + $0x18] sm:$0xff] %v706_v25  ;;  %v355_v16 = vor.u32 %v354_v19, %v353_v62  ;;  %v358_v1 = vshll.u32 %v357_v43, 23  ;;  %v1246_v56 = vshrl.u32 %v1215_v8, 16  ;;  %v2213_v24 = vand.u32 8388607, %v1017_v54 }
 0x150   :  { %v1249_v30 = vmul.u32 %v1245_v22, %v2139_v63  ;;  %v2215_v58 = vadd.s32 3, %v369_v46  ;;  %v1226_v7 = vmul.u32 %v1224_v42, %v2135_v60  ;;  %v1227_v31 = vmul.u32 %v1223_v0, %v2139_v63 }
 0x151   :  { %v359_v27 = vor.u32 4788187, %v358_v1  ;;  %v1265_v5 = vmul.u32 %v2121_v48, %v2201_v20  ;;  %v362_v21 = vcvt.s32.f32 %v355_v16  ;;  %v1248_v4 = vmul.u32 %v1246_v56, %v2135_v60 }
 0x152   :  { %v1029_v15 = vsel %vm1028_vm15, %v2144_v41, 0  ;;  %v1225_v17 = vmul.u32 %v1223_v0, %v2135_v60  ;;  %v1228_v44 = vmul.u32 %v1224_v42, %v2139_v63  ;;  %v1229_v23 = vshll.u32 %v1226_v7, 16 }
 0x153   :  { %v360_v13 = vand.u32 2147483647, %v359_v27  ;;  %v1247_v46 = vmul.u32 %v1245_v22, %v2135_v60  ;;  %v1250_v39 = vmul.u32 %v1246_v56, %v2139_v63  ;;  %v1251_v55 = vshll.u32 %v1248_v4, 16 }
 0x154   :  { %v1253_v2 = vshll.u32 %v1249_v30, 16  ;;  %v1231_v57 = vshll.u32 %v1227_v31, 16  ;;  %vm1233_vm13 = vc.u32 %v1225_v17, %v1229_v23  ;;  %v1235_v11 = vadd.s32 %v1229_v23, %v1225_v17 }
 0x155   :  { %v363_v51 = vmul.f32 %v362_v21, %v360_v13  ;;  %v1031_v59 = vand.u32 31, %v1029_v15  ;;  %v1234_v14 = vsel %vm1233_vm13, 1, %v1420_v3  ;;  %vm1255_vm14 = vc.u32 %v1247_v46, %v1251_v55 }
 0x156   :  { %v1257_v41 = vadd.s32 %v1251_v55, %v1247_v46  ;;  %v1236_v29 = vadd.s32 %v1234_v14, %v1228_v44  ;;  %vm1237_vm0 = vc.u32 %v1235_v11, %v1231_v57  ;;  %v1256_v62 = vsel %vm1255_vm14, 1, %v1420_v3 }
 0x157   :  { %v364_v53 = vxor.u32 2147483648, %v363_v51  ;;  %v2229_v47 = vsub.s32 32, %v1031_v59  ;;  %v1238_v63 = vsel %vm1237_vm0, 1, %v1420_v3  ;;  %v1258_v10 = vadd.s32 %v1256_v62, %v1250_v39 }
 0x158   :  { %vm1259_vm3 = vc.u32 %v1257_v41, %v1253_v2  ;;  %v1230_v35 = vshrl.u32 %v1226_v7, 16  ;;  %v1240_v12 = vadd.s32 %v1238_v63, %v1236_v29  ;;  %v1232_v19 = vshrl.u32 %v1227_v31, 16 }
 0x159   :  { %v365_v60 = vsel %vm244_vm1, %v364_v53, %v363_v51  ;;  %v1260_v37 = vsel %vm1259_vm3, 1, %v1420_v3  ;;  %v1252_v43 = vshrl.u32 %v1248_v4, 16  ;;  %v1254_v8 = vshrl.u32 %v1249_v30, 16 }
 0x15a   :  { %v368_v28 = vsel %vm2128_vm2, %v1859_v9, %v365_v60  ;;  %v1262_v52 = vadd.s32 %v1260_v37, %v1258_v10  ;;  %v1241_v25 = vadd.s32 %v1240_v12, %v1230_v35  ;;  %v2238_v45 = vadd.s32 %v1257_v41, %v1253_v2 }
 0x15b   :  { %v370_v6 = vmul.f32 %v368_v28, %v368_v28  ;;  %v2240_v16 = vshrl.u32 %v1029_v15, 5  ;;  %v1035_v61 = vshrl.u32 %v1422_v34, %v2229_v47  ;;  %v1034_v42 = vshll.u32 %v1421_v32, %v1031_v59 }
 0x15c   :  { %v1263_v22 = vadd.s32 %v1262_v52, %v1252_v43  ;;  %v2244_v0 = vadd.s32 %v1241_v25, %v1232_v19  ;;  %v1037_v56 = vshll.u32 %v1422_v34, %v1031_v59  ;;  %v1038_v27 = vshrl.u32 %v1423_v36, %v2229_v47 }
 0x15d   :  { %v371_v1 = vmul.f32 -0.001358992, %v370_v6  ;;  %v378_v18 = vmul.f32 -0.00019511016, %v370_v6  ;;  %v1041_v13 = vshrl.u32 %v1424_v38, %v2229_v47  ;;  %v1040_v21 = vshll.u32 %v1423_v36, %v1031_v59 }
 0x15e   :  { %v1264_v31 = vadd.s32 %v1263_v22, %v1254_v8  ;;  %vm1267_vm1 = vc.u32 %v2244_v0, %v2238_v45  ;;  %v1043_v4 = vshll.u32 %v1424_v38, %v1031_v59  ;;  %v1044_v15 = vshrl.u32 %v1425_v40, %v2229_v47 }
 0x15f   :  { %v372_v30 = vadd.f32 0.041655596, %v371_v1  ;;  %v379_v7 = vadd.f32 0.008332121, %v378_v18  ;;  %v2258_v23 = vor.u32 %v1035_v61, %v1034_v42  ;;  %v2260_v46 = vor.u32 %v1038_v27, %v1037_v56 }
 0x160   :  { %v1268_v44 = vadd.s32 1, %v1264_v31  ;;  %v1045_v51 = vor.u32 %v1044_v15, %v1043_v4  ;;  %v1046_v39 = vshll.u32 %v1425_v40, %v1031_v59  ;;  %v1047_v55 = vshrl.u32 %v1426_v49, %v2229_v47 }
 0x161   :  { %v373_v34 = vmul.f32 %v372_v30, %v370_v6  ;;  %v380_v17 = vmul.f32 %v379_v7, %v370_v6  ;;  %v2265_v38 = vor.u32 %v1041_v13, %v1040_v21  ;;  %v387_v11 = vand.u32 3, %v2215_v58 }
 0x162   :  { %v1269_v57 = vsel %vm1267_vm1, %v1268_v44, %v1264_v31  ;;  %v1025_v14 = vor.u32 8388608, %v2213_v24  ;;  %v1048_v41 = vor.u32 %v1047_v55, %v1046_v39  ;;  %vm1049_vm2 = vcmp.lt.s32.totalorder %v2240_v16, 1 }
 0x163   :  { %v374_v2 = vadd.f32 -0.4999988, %v373_v34  ;;  %v381_v36 = vadd.f32 -0.16666654, %v380_v17  ;;  %v1270_v53 = vadd.s32 %v1269_v57, %v1265_v5  ;;  %vm1052_vm4 = vcmp.lt.s32.totalorder %v2240_v16, 4 }
 0x164   :  { %vm1051_vm5 = vcmp.lt.s32.totalorder %v2240_v16, 3  ;;  %v1057_v49 = vsel %vm1049_vm2, %v2258_v23, %v2260_v46  ;;  %v1058_v48 = vsel %vm1052_vm4, %v1045_v51, 920167782  ;;  %v1061_v5 = vsel %vm1049_vm2, %v2260_v46, %v2265_v38 }
 0x165   :  { %v375_v29 = vmul.f32 %v374_v2, %v370_v6  ;;  %v382_v62 = vmul.f32 %v381_v36, %v370_v6  ;;  %v1271_v40 = vadd.s32 536870912, %v1270_v53  ;;  %v1059_v58 = vsel %vm1051_vm5, %v2265_v38, %v1058_v48 }
 0x166   :  { %v1062_v60 = vsel %vm1052_vm4, %v1048_v41, 1326507024  ;;  %v2292_v63 = vshll.u32 %v1025_v14, 8  ;;  %vm1050_vm6 = vcmp.lt.s32.totalorder %v2240_v16, 2  ;;  %vm385_vm7 = vweird.f32 %v1859_v9 }
 0x167   :  { %v376_v20 = vadd.f32 1.0, %v375_v29  ;;  %v383_v24 = vadd.f32 1.0, %v382_v62  ;;  %v2288_v59 = vshrl.u32 %v1271_v40, 30  ;;  %v1063_v12 = vsel %vm1051_vm5, %v1045_v51, %v1062_v60 }
 0x168   :  { %v1060_v6 = vsel %vm1050_vm6, %v1057_v49, %v1059_v58  ;;  %v1064_v19 = vsel %vm1050_vm6, %v1061_v5, %v1063_v12  ;;  %vm388_vm8 = vcmp.lt.s32.totalorder %v387_v11, 2  ;;  %vm389_vm11 = vcmp.eq.s32.totalorder %v387_v11, 0 }
 0x169   :  { %v384_v10 = vmul.f32 %v383_v24, %v368_v28  ;;  %v393_v35 = vxor.u32 2147483648, %v376_v20  ;;  %v1273_v37 = vshll.u32 %v2288_v59, 30  ;;  %v1068_v28 = vand.u32 65535, %v1064_v19 }
 0x16a   :  { %vm392_vm9 = vcmp.eq.s32.totalorder %v387_v11, 2  ;;  %v1066_v25 = vand.u32 65535, %v2292_v63  ;;  %v1069_v8 = vshrl.u32 %v1064_v19, 16  ;;  %v1067_v22 = vshrl.u32 %v2292_v63, 16 }
 0x16b   :  { %v390_v43 = vxor.u32 2147483648, %v384_v10  ;;  %v1274_v52 = vsub.s32 %v1270_v53, %v1273_v37  ;;  %v394_v18 = vsel %vm392_vm9, %v393_v35, %v384_v10  ;;  %v1091_v61 = vshrl.u32 %v1060_v6, 16 }
 0x16c   :  { %v1090_v27 = vand.u32 65535, %v1060_v6  ;;  %v1071_v7 = vmul.u32 %v1069_v8, %v1066_v25  ;;  %v1072_v31 = vmul.u32 %v1068_v28, %v1067_v22  ;;  %v1070_v4 = vmul.u32 %v1068_v28, %v1066_v25 }
 0x16d   :  { %v391_v1 = vsel %vm389_vm11, %v376_v20, %v390_v43  ;;  %vm1275_vm10 = vcmp.lt.s32.totalorder %v1274_v52, 0  ;;  %v1276_v56 = vsub.s32 0, %v1274_v52  ;;  %v1093_v34 = vmul.u32 %v1091_v61, %v1066_v25 }
 0x16e   :  { %v395_v42 = vsel %vm388_vm8, %v391_v1, %v394_v18  ;;  %v1074_v15 = vshll.u32 %v1071_v7, 16  ;;  %v1266_v17 = vadd.s32 %v2238_v45, %v2244_v0  ;;  %v1073_v44 = vmul.u32 %v1069_v8, %v1067_v22 }
 0x16f   :  { %v396_v30 = vsel %vm385_vm7, nan, %v395_v42  ;;  %v1277_v13 = vsel %vm1275_vm10, %v1276_v56, %v1274_v52  ;;  %v1094_v51 = vmul.u32 %v1090_v27, %v1067_v22  ;;  %v1076_v55 = vshll.u32 %v1072_v31, 16 }
 0x170   :  { %1328 = vst [vmem:[#allocation2 + $0x8] sm:$0xff] %v396_v30  ;;  %v1278_v21 = vclz %v1277_v13  ;;  %vm1078_vm12 = vc.u32 %v1070_v4, %v1074_v15  ;;  %v1080_v2 = vadd.s32 %v1074_v15, %v1070_v4  ;;  %v1075_v36 = vshrl.u32 %v1071_v7, 16 }
 0x171   :  { %v1079_v9 = vsel %vm1078_vm12, 1, %v1420_v3  ;;  %v1092_v57 = vmul.u32 %v1090_v27, %v1066_v25  ;;  %v1096_v11 = vshll.u32 %v1093_v34, 16  ;;  %v1098_v14 = vshll.u32 %v1094_v51, 16 }
 0x172   :  { %v1375_v39 = vadd.s32 4294967294, %v1278_v21  ;;  %v1081_v53 = vadd.s32 %v1079_v9, %v1073_v44  ;;  %vm1082_vm13 = vc.u32 %v1080_v2, %v1076_v55  ;;  %v1095_v49 = vmul.u32 %v1091_v61, %v1067_v22 }
 0x173   :  { %v1083_v29 = vsel %vm1082_vm13, 1, %v1420_v3  ;;  %vm1100_vm14 = vc.u32 %v1092_v57, %v1096_v11  ;;  %v1102_v45 = vadd.s32 %v1096_v11, %v1092_v57  ;;  %v1054_v20 = vsel %vm1052_vm4, %v2265_v38, 2102212464 }
 0x174   :  { %vm1376_vm15 = vcmp.lt.s32.totalorder %v1375_v39, 0  ;;  %v1085_v40 = vadd.s32 %v1083_v29, %v1081_v53  ;;  %v1101_v24 = vsel %vm1100_vm14, 1, %v1420_v3  ;;  %v1033_v35 = vshrl.u32 %v1421_v32, %v2229_v47 }
 0x175   :  { %v1281_v41 = vsel %vm1376_vm15, 0, %v1375_v39  ;;  %vm1104_vm0 = vc.u32 %v1102_v45, %v1098_v14  ;;  %v1103_v10 = vadd.s32 %v1101_v24, %v1095_v49  ;;  %v1077_v12 = vshrl.u32 %v1072_v31, 16 }
 0x176   :  { %v1282_v0 = vsub.s32 32, %v1281_v41  ;;  %v1286_v62 = vsub.s32 4294967266, %v1281_v41  ;;  %v1283_v48 = vshll.u32 %v1274_v52, %v1281_v41  ;;  %v1086_v60 = vadd.s32 %v1085_v40, %v1075_v36 }
 0x177   :  { %v1105_v37 = vsel %vm1104_vm0, 1, %v1420_v3  ;;  %v1097_v43 = vshrl.u32 %v1093_v34, 16  ;;  %v1053_v38 = vsel %vm1049_vm2, %v1033_v35, %v2258_v23  ;;  %v1055_v52 = vsel %vm1051_vm5, %v2260_v46, %v1054_v20 }
 0x178   :  { %v1284_v58 = vshrl.u32 %v1266_v17, %v1282_v0  ;;  %v1287_v5 = vadd.s32 127, %v1286_v62  ;;  %v1107_v28 = vadd.s32 %v1105_v37, %v1103_v10  ;;  %v1087_v25 = vadd.s32 %v1086_v60, %v1077_v12 }
 0x179   :  { %v1099_v1 = vshrl.u32 %v1094_v51, 16  ;;  %v1106_v32 = vadd.s32 %v1102_v45, %v1098_v14  ;;  %v1056_v3 = vsel %vm1050_vm6, %v1053_v38, %v1055_v52  ;;  %vm1174_vm1 = vcmp.lt.s32.totalorder %v2089_v33, 0 }
 0x17a   :  { %v1285_v6 = vor.u32 %v1284_v58, %v1283_v48  ;;  %v1288_v19 = vshll.u32 %v1287_v5, 23  ;;  %v1108_v18 = vadd.s32 %v1107_v28, %v1097_v43  ;;  %v1110_v23 = vmul.u32 %v2292_v63, %v1056_v3 }
 0x17b   :  { %vm1112_vm3 = vc.u32 %v1087_v25, %v1106_v32  ;;  %vm2330_vm2 = vcmp.le.f32.partialorder %v1172_v50, 0.7853982  ;;  %v1296_v16 = vsub.s32 4, %v2288_v59  ;;  %v1111_v58 = vadd.s32 %v1106_v32, %v1087_v25 }
 0x17c   :  { %v1289_v8 = vor.u32 4788187, %v1288_v19  ;;  %v1292_v22 = vcvt.s32.f32 %v1285_v6  ;;  %v1109_v61 = vadd.s32 %v1108_v18, %v1099_v1  ;;  %vm1315_vm11 = vweird.f32 %v2089_v33 }
 0x17d   :  { %v1297_v17 = vsel %vm1174_vm1, %v1296_v16, %v2288_v59  ;;  %vm1019_vm9 = vcmp.lt.s32.totalorder %v2100_v26, 0  ;;  %vm1018_vm10 = vcmp.le.f32.partialorder %v1017_v54, 0.7853982  ;;  %vm1160_vm14 = vweird.f32 %v2100_v26 }
 0x17e   :  { %v1290_v47 = vand.u32 2147483647, %v1289_v8  ;;  %v1113_v56 = vadd.s32 1, %v1109_v61  ;;  %v1299_v55 = vsel %vm2330_vm2, 0, %v1297_v17 }
 0x17f   :  { %v1316_v53 = vadd.s32 3, %v1299_v55 }
 0x180   :  { %v1293_v42 = vmul.f32 %v1292_v22, %v1290_v47  ;;  %v1114_v30 = vsel %vm1112_vm3, %v1113_v56, %v1109_v61 }
 0x181   :  { %v1115_v46 = vadd.s32 %v1114_v30, %v1110_v23  ;;  %v1317_v40 = vand.u32 3, %v1316_v53 }
 0x182   :  { %v1294_v27 = vxor.u32 2147483648, %v1293_v42 }
 0x183   :  { %v1116_v21 = vadd.s32 536870912, %v1115_v46  ;;  %vm1319_vm6 = vcmp.eq.s32.totalorder %v1317_v40, 0  ;;  %vm1322_vm7 = vcmp.eq.s32.totalorder %v1317_v40, 2  ;;  %vm1318_vm8 = vcmp.lt.s32.totalorder %v1317_v40, 2 }
 0x184   :  { %v1295_v31 = vsel %vm1174_vm1, %v1294_v27, %v1293_v42 }
 0x185   :  { %v1298_v13 = vsel %vm2330_vm2, %v2089_v33, %v1295_v31  ;;  %v1117_v4 = vshrl.u32 %v1116_v21, 30 }
 0x186   :  { %v1300_v63 = vmul.f32 %v1298_v13, %v1298_v13 }
 0x187   :  { %v1118_v44 = vshll.u32 %v1117_v4, 30  ;;  %v1141_v47 = vsub.s32 4, %v1117_v4 }
 0x188   :  { %v1301_v15 = vmul.f32 -0.001358992, %v1300_v63  ;;  %v1308_v34 = vmul.f32 -0.00019511016, %v1300_v63 }
 0x189   :  { %v1119_v39 = vsub.s32 %v1115_v46, %v1118_v44  ;;  %v1142_v42 = vsel %vm1019_vm9, %v1141_v47, %v1117_v4 }
 0x18a   :  { %v1302_v51 = vadd.f32 0.041655596, %v1301_v15  ;;  %v1309_v50 = vadd.f32 0.008332121, %v1308_v34  ;;  %v1144_v27 = vsel %vm1018_vm10, 0, %v1142_v42 }
 0x18b   :  { %vm1120_vm4 = vcmp.lt.s32.totalorder %v1119_v39, 0  ;;  %v1121_v9 = vsub.s32 0, %v1119_v39  ;;  %v1161_v16 = vadd.s32 3, %v1144_v27 }
 0x18c   :  { %v1303_v2 = vmul.f32 %v1302_v51, %v1300_v63  ;;  %v1310_v36 = vmul.f32 %v1309_v50, %v1300_v63 }
 0x18d   :  { %v1122_v14 = vsel %vm1120_vm4, %v1121_v9, %v1119_v39  ;;  %v1162_v15 = vand.u32 3, %v1161_v16 }
 0x18e   :  { %v1304_v57 = vadd.f32 -0.4999988, %v1303_v2  ;;  %v1311_v11 = vadd.f32 -0.16666654, %v1310_v36  ;;  %v1123_v45 = vclz %v1122_v14 }
 0x18f   :  { %vm1164_vm12 = vcmp.eq.s32.totalorder %v1162_v15, 0  ;;  %vm1167_vm15 = vcmp.eq.s32.totalorder %v1162_v15, 2  ;;  %vm1163_vm13 = vcmp.lt.s32.totalorder %v1162_v15, 2 }
 0x190   :  { %v1305_v41 = vmul.f32 %v1304_v57, %v1300_v63  ;;  %v1312_v29 = vmul.f32 %v1311_v11, %v1300_v63  ;;  %v1372_v62 = vadd.s32 4294967294, %v1123_v45 }
 0x192   :  { %v1306_v0 = vadd.f32 1.0, %v1305_v41  ;;  %v1313_v59 = vadd.f32 1.0, %v1312_v29  ;;  %vm1373_vm5 = vcmp.lt.s32.totalorder %v1372_v62, 0 }
 0x193   :  { %v1126_v20 = vsel %vm1373_vm5, 0, %v1372_v62 }
 0x194   :  { %v1314_v49 = vmul.f32 %v1313_v59, %v1298_v13  ;;  %v1323_v48 = vxor.u32 2147483648, %v1306_v0  ;;  %v1127_v5 = vsub.s32 32, %v1126_v20  ;;  %v1131_v60 = vsub.s32 4294967266, %v1126_v20 }
 0x195   :  { %v1128_v6 = vshll.u32 %v1119_v39, %v1126_v20 }
 0x196   :  { %v1320_v24 = vxor.u32 2147483648, %v1314_v49  ;;  %v1324_v35 = vsel %vm1322_vm7, %v1323_v48, %v1314_v49  ;;  %v1129_v12 = vshrl.u32 %v1111_v58, %v1127_v5  ;;  %v1132_v19 = vadd.s32 127, %v1131_v60 }
 0x198   :  { %v1321_v10 = vsel %vm1319_vm6, %v1306_v0, %v1320_v24  ;;  %v1130_v28 = vor.u32 %v1129_v12, %v1128_v6  ;;  %v1133_v38 = vshll.u32 %v1132_v19, 23 }
 0x199   :  { %v1325_v37 = vsel %vm1318_vm8, %v1321_v10, %v1324_v35 }
 0x19a   :  { %v1326_v43 = vsel %vm1315_vm11, nan, %v1325_v37  ;;  %v1134_v52 = vor.u32 4788187, %v1133_v38  ;;  %v1137_v25 = vcvt.s32.f32 %v1130_v28 }
 0x19b   :  { %1334 = vst [vmem:[#allocation2 + $0x38] sm:$0xff] %v1326_v43 }
 0x19c   :  { %v1135_v8 = vand.u32 2147483647, %v1134_v52 }
 0x19e   :  { %v1138_v1 = vmul.f32 %v1137_v25, %v1135_v8 }
 0x1a0   :  { %v1139_v18 = vxor.u32 2147483648, %v1138_v1 }
 0x1a2   :  { %v1140_v32 = vsel %vm1019_vm9, %v1139_v18, %v1138_v1 }
 0x1a3   :  { %v1143_v33 = vsel %vm1018_vm10, %v2100_v26, %v1140_v32 }
 0x1a4   :  { %v1145_v22 = vmul.f32 %v1143_v33, %v1143_v33 }
 0x1a6   :  { %v1146_v3 = vmul.f32 -0.001358992, %v1145_v22  ;;  %v1153_v61 = vmul.f32 -0.00019511016, %v1145_v22 }
 0x1a8   :  { %v1147_v56 = vadd.f32 0.041655596, %v1146_v3  ;;  %v1154_v23 = vadd.f32 0.008332121, %v1153_v61 }
 0x1aa   :  { %v1148_v30 = vmul.f32 %v1147_v56, %v1145_v22  ;;  %v1155_v46 = vmul.f32 %v1154_v23, %v1145_v22 }
 0x1ac   :  { %v1149_v7 = vadd.f32 -0.4999988, %v1148_v30  ;;  %v1156_v31 = vadd.f32 -0.16666654, %v1155_v46 }
 0x1ae   :  { %v1150_v13 = vmul.f32 %v1149_v7, %v1145_v22  ;;  %v1157_v21 = vmul.f32 %v1156_v31, %v1145_v22 }
 0x1b0   :  { %v1151_v63 = vadd.f32 1.0, %v1150_v13  ;;  %v1158_v54 = vadd.f32 1.0, %v1157_v21 }
 0x1b2   :  { %v1159_v34 = vmul.f32 %v1158_v54, %v1143_v33  ;;  %v1168_v17 = vxor.u32 2147483648, %v1151_v63 }
 0x1b4   :  { %v1165_v4 = vxor.u32 2147483648, %v1159_v34  ;;  %v1169_v51 = vsel %vm1167_vm15, %v1168_v17, %v1159_v34 }
 0x1b6   :  { %v1166_v44 = vsel %vm1164_vm12, %v1151_v63, %v1165_v4 }
 0x1b7   :  { %v1170_v50 = vsel %vm1163_vm13, %v1166_v44, %v1169_v51 }
 0x1b8   :  { %v1171_v39 = vsel %vm1160_vm14, nan, %v1170_v50 }
 0x1b9   :  { %1333 = vst [vmem:[#allocation2 + $0x30] sm:$0xff] %v1171_v39 }
 0x1ba   :  { %1347 = dma.vmem_to_hbm [thread:$0]  %s1340_s10, 1024, %s1342_s8, [#allocation3], %s1428_s11, %s1428_s11, %s1429_s12  }
 0x1bb   :  { %1418 = dma.done.wait [#allocation3], 1024  }
 0x1bc   :  { %1419 = vsyncadd [#allocation3], 4294966272 }
 0x1bd   :  { %1352 = vsyncpa [#allocation3], 1 }

</bundles_post_ra>
